<compile_context>
chip_gen: v7x
topology: tpu7x:2x2x1
jax: 0.10.0
libtpu: 0.0.40
codegen_flags: <defaults>
</compile_context>

<pallas_src>
import jax
import jax.numpy as jnp
import numpy as np
from jax.experimental import pallas as pl
from jax.experimental.pallas import tpu as pltpu

# ---- problem sizes (small, consistent with the module) -----------------------
INPUT_DIM = 6
HIDDEN = 32
OUTPUT_DIM = 2
N_LAYERS = 2
BATCH = 2
SEQ = 8
PRED_FRAMES = 4


def _vmem():
    return pl.BlockSpec(memory_space=pltpu.MemorySpace.VMEM)


# =============================================================================
# Fused kernel: pre-MLP -> multi-layer GRU (unrolled) -> slice+ReLU -> post-MLP
# =============================================================================
def _make_fused_kernel(B, T, H, L, P):
    def kernel(x_ref, h0_ref,
               w1_ref, b1_ref, w2_ref, b2_ref, w3_ref, b3_ref, w4_ref, b4_ref,
               wih_ref, whh_ref, bih_ref, bhh_ref,
               w5_ref, b5_ref, w6_ref, b6_ref, wf_ref, bf_ref,
               out_ref, h_ref):
        f32 = jnp.float32

        # ---------------- pre-GRU MLP on the whole (T*B, D) time-major slab ----
        x = x_ref[...]
        h = jnp.tanh(jnp.dot(x, w1_ref[...], preferred_element_type=f32)
                     + b1_ref[...])
        h = jnp.maximum(jnp.dot(h, w2_ref[...], preferred_element_type=f32)
                        + b2_ref[...], 0.0)
        h = jnp.maximum(jnp.dot(h, w3_ref[...], preferred_element_type=f32)
                        + b3_ref[...], 0.0)
        h = jnp.dot(h, w4_ref[...], preferred_element_type=f32) + b4_ref[...]
        # h: (T*B, H) = GRU input sequence, row = t*B + b

        # ---------------- load GRU weights once (fused [r|z|n] layout) ---------
        wih = [wih_ref[l] for l in range(L)]                               # (H, 3H)
        whh = [whh_ref[l] for l in range(L)]                               # (H, 3H)
        # Hoisted bias broadcasts (not re-emitted inside the unrolled loop).
        bih_b = [jnp.broadcast_to(bih_ref[l], (B, 3 * H)) for l in range(L)]
        bhh_b = [jnp.broadcast_to(bhh_ref[l], (B, 3 * H)) for l in range(L)]

        # Hoisted layer-0 input projection: one wide GEMM for all timesteps.
        g0 = (jnp.dot(h, wih[0], preferred_element_type=f32)
              + jnp.broadcast_to(bih_ref[0], (T * B, 3 * H)))              # (T*B, 3H)

        # ---------------- recurrence, fully unrolled ----------------------------
        h_state = [h0_ref[l] for l in range(L)]                            # each (B, H)
        outs = []
        for t in range(T):
            # contiguous static sublane slice: precomputed layer-0 gates at step t
            gi = g0[t * B:(t + 1) * B, :]                                  # (B, 3H)
            inp = None
            for l in range(L):
                hp = h_state[l]
                if l > 0:
                    gi = (jnp.dot(inp, wih[l], preferred_element_type=f32)
                          + bih_b[l])
                gh = jnp.dot(hp, whh[l], preferred_element_type=f32) + bhh_b[l]
                r = jax.nn.sigmoid(gi[:, 0:H] + gh[:, 0:H])
                z = jax.nn.sigmoid(gi[:, H:2 * H] + gh[:, H:2 * H])
                n = jnp.tanh(gi[:, 2 * H:3 * H] + r * gh[:, 2 * H:3 * H])
                h_new = (1.0 - z) * n + z * hp
                h_state[l] = h_new
                inp = h_new
            if t >= T - P:
                outs.append(inp)

        # ---------------- final hidden state ------------------------------------
        for l in range(L):
            h_ref[l] = h_state[l]

        # ---------------- post-GRU MLP on the last P steps (time-major rows) ----
        # P contiguous (B, H) blocks -> one (P*B, H) slab; row = p*B + b.
        o = jnp.maximum(jnp.concatenate(outs, axis=0), 0.0)   # relu(out[:, -P:])
        e = jnp.maximum(jnp.dot(o, w5_ref[...], preferred_element_type=f32)
                        + b5_ref[...], 0.0)
        e = jnp.maximum(jnp.dot(e, w6_ref[...], preferred_element_type=f32)
                        + b6_ref[...], 0.0)
        out_ref[...] = (jnp.dot(e, wf_ref[...], preferred_element_type=f32)
                        + bf_ref[...])

    return kernel


def motion_gru_forward(x, h0, params, pred_frames=PRED_FRAMES):
    (w1, b1, w2, b2, w3, b3, w4, b4,
     wih, whh, bih, bhh,
     w5, b5, w6, b6, wf, bf) = params
    B, T, d_in = x.shape
    L, _, H = h0.shape
    P = pred_frames

    # Time-major rows (row = t*B + b): one tiny wrapper-side transpose lets the
    # kernel address each timestep as a dense static slice (no in-kernel gathers).
    x_tm = jnp.transpose(x, (1, 0, 2)).reshape(T * B, d_in)

    kernel = _make_fused_kernel(B, T, H, L, P)
    e_tm, h_final = pl.pallas_call(
        kernel,
        out_shape=(jax.ShapeDtypeStruct((P * B, OUTPUT_DIM), jnp.float32),
                   jax.ShapeDtypeStruct((L, B, H), jnp.float32)),
        in_specs=[_vmem()] * 20,
        out_specs=(_vmem(), _vmem()),
    )(x_tm, h0, w1, b1, w2, b2, w3, b3, w4, b4,
      wih, whh, bih, bhh, w5, b5, w6, b6, wf, bf)

    # (P*B, 2) time-major -> (B, P, 2); tiny wrapper-side layout plumbing.
    out_eye = jnp.transpose(e_tm.reshape(P, B, OUTPUT_DIM), (1, 0, 2))
    return out_eye, h_final


# =============================================================================
# Deterministic parameter init + pure-JAX reference for verification
# =============================================================================
def init_params(key):
    ks = list(jax.random.split(key, 12))

    def lin(k, fan_in, fan_out):
        kw, kb = jax.random.split(k)
        bound = 1.0 / np.sqrt(fan_in)
        w = jax.random.uniform(kw, (fan_in, fan_out), jnp.float32, -bound, bound)
        b = jax.random.uniform(kb, (1, fan_out), jnp.float32, -bound, bound)
        return w, b

    w1, b1 = lin(ks[0], INPUT_DIM, HIDDEN)
    w2, b2 = lin(ks[1], HIDDEN, HIDDEN)
    w3, b3 = lin(ks[2], HIDDEN, HIDDEN)
    w4, b4 = lin(ks[3], HIDDEN, HIDDEN)
    w5, b5 = lin(ks[4], HIDDEN, HIDDEN)
    w6, b6 = lin(ks[5], HIDDEN, HIDDEN)
    wf, bf = lin(ks[6], HIDDEN, OUTPUT_DIM)

    gb = 1.0 / np.sqrt(HIDDEN)
    # Fused gate layout, pre-transposed: columns ordered [r | z | n] (PyTorch order)
    wih = jax.random.uniform(ks[7], (N_LAYERS, HIDDEN, 3 * HIDDEN), jnp.float32, -gb, gb)
    whh = jax.random.uniform(ks[8], (N_LAYERS, HIDDEN, 3 * HIDDEN), jnp.float32, -gb, gb)
    bih = jax.random.uniform(ks[9], (N_LAYERS, 1, 3 * HIDDEN), jnp.float32, -gb, gb)
    bhh = jax.random.uniform(ks[10], (N_LAYERS, 1, 3 * HIDDEN), jnp.float32, -gb, gb)

    return (w1, b1, w2, b2, w3, b3, w4, b4,
            wih, whh, bih, bhh,
            w5, b5, w6, b6, wf, bf)


def reference_forward(x, h0, params, pred_frames=PRED_FRAMES):
    (w1, b1, w2, b2, w3, b3, w4, b4,
     wih, whh, bih, bhh,
     w5, b5, w6, b6, wf, bf) = params
    H = HIDDEN
    h = jnp.tanh(x @ w1 + b1)
    h = jnp.maximum(h @ w2 + b2, 0.0)
    h = jnp.maximum(h @ w3 + b3, 0.0)
    h = h @ w4 + b4
    x_tbh = jnp.transpose(h, (1, 0, 2))
    hidden = [h0[l] for l in range(N_LAYERS)]
    outs = []
    for t in range(x_tbh.shape[0]):
        inp = x_tbh[t]
        for l in range(N_LAYERS):
            hp = hidden[l]
            gi = inp @ wih[l] + bih[l]
            gh = hp @ whh[l] + bhh[l]
            r = jax.nn.sigmoid(gi[:, 0:H] + gh[:, 0:H])
            z = jax.nn.sigmoid(gi[:, H:2 * H] + gh[:, H:2 * H])
            n = jnp.tanh(gi[:, 2 * H:3 * H] + r * gh[:, 2 * H:3 * H])
            hn = (1.0 - z) * n + z * hp
            hidden[l] = hn
            inp = hn
        outs.append(inp)
    out = jnp.stack(outs, axis=1)                 # (B, T, H)
    h_final = jnp.stack(hidden, axis=0)           # (L, B, H)
    o = jnp.maximum(out[:, -pred_frames:], 0.0)
    e = jnp.maximum(o @ w5 + b5, 0.0)
    e = jnp.maximum(e @ w6 + b6, 0.0)
    e = e @ wf + bf
    return e, h_final


if __name__ == "__main__":
    key = jax.random.PRNGKey(0)
    k_x, k_p = jax.random.split(key)
    x = jax.random.normal(k_x, (BATCH, SEQ, INPUT_DIM), jnp.float32)
    h0 = jnp.zeros((N_LAYERS, BATCH, HIDDEN), jnp.float32)   # init_hidden()
    params = init_params(k_p)

    out_eye, h_final = motion_gru_forward(x, h0, params, PRED_FRAMES)
    out_eye = jax.block_until_ready(out_eye)
    h_final = jax.block_until_ready(h_final)

    ref_out, ref_h = reference_forward(x, h0, params, PRED_FRAMES)
    np.testing.assert_allclose(np.asarray(out_eye), np.asarray(ref_out),
                               rtol=1e-5, atol=1e-5)
    np.testing.assert_allclose(np.asarray(h_final), np.asarray(ref_h),
                               rtol=1e-5, atol=1e-5)
    print("KERNEL_OK")
</pallas_src>

<mosaic_0001>
module attributes {stable_mosaic.version = 11 : i64} {
  func.func @kernel(%arg0: memref<16x6xf32, #tpu.memory_space<vmem>>, %arg1: memref<2x2x32xf32, #tpu.memory_space<vmem>>, %arg2: memref<6x32xf32, #tpu.memory_space<vmem>>, %arg3: memref<1x32xf32, #tpu.memory_space<vmem>>, %arg4: memref<32x32xf32, #tpu.memory_space<vmem>>, %arg5: memref<1x32xf32, #tpu.memory_space<vmem>>, %arg6: memref<32x32xf32, #tpu.memory_space<vmem>>, %arg7: memref<1x32xf32, #tpu.memory_space<vmem>>, %arg8: memref<32x32xf32, #tpu.memory_space<vmem>>, %arg9: memref<1x32xf32, #tpu.memory_space<vmem>>, %arg10: memref<2x32x96xf32, #tpu.memory_space<vmem>>, %arg11: memref<2x32x96xf32, #tpu.memory_space<vmem>>, %arg12: memref<2x1x96xf32, #tpu.memory_space<vmem>>, %arg13: memref<2x1x96xf32, #tpu.memory_space<vmem>>, %arg14: memref<32x32xf32, #tpu.memory_space<vmem>>, %arg15: memref<1x32xf32, #tpu.memory_space<vmem>>, %arg16: memref<32x32xf32, #tpu.memory_space<vmem>>, %arg17: memref<1x32xf32, #tpu.memory_space<vmem>>, %arg18: memref<32x2xf32, #tpu.memory_space<vmem>>, %arg19: memref<1x2xf32, #tpu.memory_space<vmem>>, %arg20: memref<8x2xf32, #tpu.memory_space<vmem>>, %arg21: memref<2x2x32xf32, #tpu.memory_space<vmem>>) attributes {dimension_semantics = [], scalar_prefetch = 0 : i64, scratch_operands = 0 : i64, tpu.core_type = #tpu.core_type<tc>} {
    %c0 = arith.constant 0 : index
    %c0_0 = arith.constant 0 : index
    %0 = vector.load %arg0[%c0, %c0_0] : memref<16x6xf32, #tpu.memory_space<vmem>>, vector<16x6xf32>
    %c0_1 = arith.constant 0 : index
    %c0_2 = arith.constant 0 : index
    %1 = vector.load %arg2[%c0_1, %c0_2] : memref<6x32xf32, #tpu.memory_space<vmem>>, vector<6x32xf32>
    %cst = arith.constant dense<0.000000e+00> : vector<16x32xf32>
    %2 = tpu.matmul %0, %1, %cst {dimension_numbers = #tpu.dot_dimension_numbers<[1], [0], [0], [1], [0, 0, 1, 1], [], []>} : vector<16x6xf32>, vector<6x32xf32>, vector<16x32xf32> -> vector<16x32xf32>
    %c0_3 = arith.constant 0 : index
    %c0_4 = arith.constant 0 : index
    %3 = vector.load %arg3[%c0_3, %c0_4] : memref<1x32xf32, #tpu.memory_space<vmem>>, vector<1x32xf32>
    %4 = vector.broadcast %3 : vector<1x32xf32> to vector<16x32xf32>
    %5 = arith.addf %2, %4 : vector<16x32xf32>
    %6 = math.tanh %5 : vector<16x32xf32>
    %c0_5 = arith.constant 0 : index
    %c0_6 = arith.constant 0 : index
    %7 = vector.load %arg4[%c0_5, %c0_6] : memref<32x32xf32, #tpu.memory_space<vmem>>, vector<32x32xf32>
    %cst_7 = arith.constant dense<0.000000e+00> : vector<16x32xf32>
    %8 = tpu.matmul %6, %7, %cst_7 {dimension_numbers = #tpu.dot_dimension_numbers<[1], [0], [0], [1], [0, 0, 1, 1], [], []>} : vector<16x32xf32>, vector<32x32xf32>, vector<16x32xf32> -> vector<16x32xf32>
    %c0_8 = arith.constant 0 : index
    %c0_9 = arith.constant 0 : index
    %9 = vector.load %arg5[%c0_8, %c0_9] : memref<1x32xf32, #tpu.memory_space<vmem>>, vector<1x32xf32>
    %10 = vector.broadcast %9 : vector<1x32xf32> to vector<16x32xf32>
    %11 = arith.addf %8, %10 : vector<16x32xf32>
    %cst_10 = arith.constant 0.000000e+00 : f32
    %12 = vector.broadcast %cst_10 : f32 to vector<16x32xf32>
    %13 = arith.maximumf %11, %12 : vector<16x32xf32>
    %c0_11 = arith.constant 0 : index
    %c0_12 = arith.constant 0 : index
    %14 = vector.load %arg6[%c0_11, %c0_12] : memref<32x32xf32, #tpu.memory_space<vmem>>, vector<32x32xf32>
    %cst_13 = arith.constant dense<0.000000e+00> : vector<16x32xf32>
    %15 = tpu.matmul %13, %14, %cst_13 {dimension_numbers = #tpu.dot_dimension_numbers<[1], [0], [0], [1], [0, 0, 1, 1], [], []>} : vector<16x32xf32>, vector<32x32xf32>, vector<16x32xf32> -> vector<16x32xf32>
    %c0_14 = arith.constant 0 : index
    %c0_15 = arith.constant 0 : index
    %16 = vector.load %arg7[%c0_14, %c0_15] : memref<1x32xf32, #tpu.memory_space<vmem>>, vector<1x32xf32>
    %17 = vector.broadcast %16 : vector<1x32xf32> to vector<16x32xf32>
    %18 = arith.addf %15, %17 : vector<16x32xf32>
    %cst_16 = arith.constant 0.000000e+00 : f32
    %19 = vector.broadcast %cst_16 : f32 to vector<16x32xf32>
    %20 = arith.maximumf %18, %19 : vector<16x32xf32>
    %c0_17 = arith.constant 0 : index
    %c0_18 = arith.constant 0 : index
    %21 = vector.load %arg8[%c0_17, %c0_18] : memref<32x32xf32, #tpu.memory_space<vmem>>, vector<32x32xf32>
    %cst_19 = arith.constant dense<0.000000e+00> : vector<16x32xf32>
    %22 = tpu.matmul %20, %21, %cst_19 {dimension_numbers = #tpu.dot_dimension_numbers<[1], [0], [0], [1], [0, 0, 1, 1], [], []>} : vector<16x32xf32>, vector<32x32xf32>, vector<16x32xf32> -> vector<16x32xf32>
    %c0_20 = arith.constant 0 : index
    %c0_21 = arith.constant 0 : index
    %23 = vector.load %arg9[%c0_20, %c0_21] : memref<1x32xf32, #tpu.memory_space<vmem>>, vector<1x32xf32>
    %24 = vector.broadcast %23 : vector<1x32xf32> to vector<16x32xf32>
    %25 = arith.addf %22, %24 : vector<16x32xf32>
    %c0_22 = arith.constant 0 : index
    %c0_23 = arith.constant 0 : index
    %c0_24 = arith.constant 0 : index
    %26 = vector.load %arg10[%c0_22, %c0_23, %c0_24] : memref<2x32x96xf32, #tpu.memory_space<vmem>>, vector<1x32x96xf32>
    %27 = vector.shape_cast %26 : vector<1x32x96xf32> to vector<32x96xf32>
    %c1 = arith.constant 1 : index
    %c0_25 = arith.constant 0 : index
    %c0_26 = arith.constant 0 : index
    %28 = vector.load %arg10[%c1, %c0_25, %c0_26] : memref<2x32x96xf32, #tpu.memory_space<vmem>>, vector<1x32x96xf32>
    %29 = vector.shape_cast %28 : vector<1x32x96xf32> to vector<32x96xf32>
    %c0_27 = arith.constant 0 : index
    %c0_28 = arith.constant 0 : index
    %c0_29 = arith.constant 0 : index
    %30 = vector.load %arg11[%c0_27, %c0_28, %c0_29] : memref<2x32x96xf32, #tpu.memory_space<vmem>>, vector<1x32x96xf32>
    %31 = vector.shape_cast %30 : vector<1x32x96xf32> to vector<32x96xf32>
    %c1_30 = arith.constant 1 : index
    %c0_31 = arith.constant 0 : index
    %c0_32 = arith.constant 0 : index
    %32 = vector.load %arg11[%c1_30, %c0_31, %c0_32] : memref<2x32x96xf32, #tpu.memory_space<vmem>>, vector<1x32x96xf32>
    %33 = vector.shape_cast %32 : vector<1x32x96xf32> to vector<32x96xf32>
    %c1_33 = arith.constant 1 : index
    %c0_34 = arith.constant 0 : index
    %c0_35 = arith.constant 0 : index
    %34 = vector.load %arg12[%c1_33, %c0_34, %c0_35] : memref<2x1x96xf32, #tpu.memory_space<vmem>>, vector<1x1x96xf32>
    %35 = vector.shape_cast %34 : vector<1x1x96xf32> to vector<1x96xf32>
    %36 = vector.shape_cast %35 : vector<1x96xf32> to vector<1x96xf32>
    %37 = vector.broadcast %36 : vector<1x96xf32> to vector<2x96xf32>
    %c0_36 = arith.constant 0 : index
    %c0_37 = arith.constant 0 : index
    %c0_38 = arith.constant 0 : index
    %38 = vector.load %arg13[%c0_36, %c0_37, %c0_38] : memref<2x1x96xf32, #tpu.memory_space<vmem>>, vector<1x1x96xf32>
    %39 = vector.shape_cast %38 : vector<1x1x96xf32> to vector<1x96xf32>
    %40 = vector.shape_cast %39 : vector<1x96xf32> to vector<1x96xf32>
    %41 = vector.broadcast %40 : vector<1x96xf32> to vector<2x96xf32>
    %c1_39 = arith.constant 1 : index
    %c0_40 = arith.constant 0 : index
    %c0_41 = arith.constant 0 : index
    %42 = vector.load %arg13[%c1_39, %c0_40, %c0_41] : memref<2x1x96xf32, #tpu.memory_space<vmem>>, vector<1x1x96xf32>
    %43 = vector.shape_cast %42 : vector<1x1x96xf32> to vector<1x96xf32>
    %44 = vector.shape_cast %43 : vector<1x96xf32> to vector<1x96xf32>
    %45 = vector.broadcast %44 : vector<1x96xf32> to vector<2x96xf32>
    %cst_42 = arith.constant dense<0.000000e+00> : vector<16x96xf32>
    %46 = tpu.matmul %25, %27, %cst_42 {dimension_numbers = #tpu.dot_dimension_numbers<[1], [0], [0], [1], [0, 0, 1, 1], [], []>} : vector<16x32xf32>, vector<32x96xf32>, vector<16x96xf32> -> vector<16x96xf32>
    %c0_43 = arith.constant 0 : index
    %c0_44 = arith.constant 0 : index
    %c0_45 = arith.constant 0 : index
    %47 = vector.load %arg12[%c0_43, %c0_44, %c0_45] : memref<2x1x96xf32, #tpu.memory_space<vmem>>, vector<1x1x96xf32>
    %48 = vector.shape_cast %47 : vector<1x1x96xf32> to vector<1x96xf32>
    %49 = vector.shape_cast %48 : vector<1x96xf32> to vector<1x96xf32>
    %50 = vector.broadcast %49 : vector<1x96xf32> to vector<16x96xf32>
    %51 = arith.addf %46, %50 : vector<16x96xf32>
    %c0_46 = arith.constant 0 : index
    %c0_47 = arith.constant 0 : index
    %c0_48 = arith.constant 0 : index
    %52 = vector.load %arg1[%c0_46, %c0_47, %c0_48] : memref<2x2x32xf32, #tpu.memory_space<vmem>>, vector<1x2x32xf32>
    %53 = vector.shape_cast %52 : vector<1x2x32xf32> to vector<2x32xf32>
    %c1_49 = arith.constant 1 : index
    %c0_50 = arith.constant 0 : index
    %c0_51 = arith.constant 0 : index
    %54 = vector.load %arg1[%c1_49, %c0_50, %c0_51] : memref<2x2x32xf32, #tpu.memory_space<vmem>>, vector<1x2x32xf32>
    %55 = vector.shape_cast %54 : vector<1x2x32xf32> to vector<2x32xf32>
    %56 = vector.extract_strided_slice %51 {offsets = [0, 0], sizes = [2, 96], strides = [1, 1]} : vector<16x96xf32> to vector<2x96xf32>
    %cst_52 = arith.constant dense<0.000000e+00> : vector<2x96xf32>
    %57 = tpu.matmul %53, %31, %cst_52 {dimension_numbers = #tpu.dot_dimension_numbers<[1], [0], [0], [1], [0, 0, 1, 1], [], []>} : vector<2x32xf32>, vector<32x96xf32>, vector<2x96xf32> -> vector<2x96xf32>
    %58 = arith.addf %57, %41 : vector<2x96xf32>
    %59 = vector.extract_strided_slice %56 {offsets = [0, 0], sizes = [2, 32], strides = [1, 1]} : vector<2x96xf32> to vector<2x32xf32>
    %60 = vector.extract_strided_slice %58 {offsets = [0, 0], sizes = [2, 32], strides = [1, 1]} : vector<2x96xf32> to vector<2x32xf32>
    %61 = arith.addf %59, %60 : vector<2x32xf32>
    %62 = arith.negf %61 : vector<2x32xf32>
    %63 = math.exp %62 : vector<2x32xf32>
    %cst_53 = arith.constant 1.000000e+00 : f32
    %64 = vector.broadcast %cst_53 : f32 to vector<2x32xf32>
    %65 = arith.addf %64, %63 : vector<2x32xf32>
    %66 = arith.divf %64, %65 : vector<2x32xf32>
    %67 = vector.extract_strided_slice %56 {offsets = [0, 32], sizes = [2, 32], strides = [1, 1]} : vector<2x96xf32> to vector<2x32xf32>
    %68 = vector.extract_strided_slice %58 {offsets = [0, 32], sizes = [2, 32], strides = [1, 1]} : vector<2x96xf32> to vector<2x32xf32>
    %69 = arith.addf %67, %68 : vector<2x32xf32>
    %70 = arith.negf %69 : vector<2x32xf32>
    %71 = math.exp %70 : vector<2x32xf32>
    %cst_54 = arith.constant 1.000000e+00 : f32
    %72 = vector.broadcast %cst_54 : f32 to vector<2x32xf32>
    %73 = arith.addf %72, %71 : vector<2x32xf32>
    %74 = arith.divf %72, %73 : vector<2x32xf32>
    %75 = vector.extract_strided_slice %56 {offsets = [0, 64], sizes = [2, 32], strides = [1, 1]} : vector<2x96xf32> to vector<2x32xf32>
    %76 = vector.extract_strided_slice %58 {offsets = [0, 64], sizes = [2, 32], strides = [1, 1]} : vector<2x96xf32> to vector<2x32xf32>
    %77 = arith.mulf %66, %76 : vector<2x32xf32>
    %78 = arith.addf %75, %77 : vector<2x32xf32>
    %79 = math.tanh %78 : vector<2x32xf32>
    %cst_55 = arith.constant 1.000000e+00 : f32
    %80 = vector.broadcast %cst_55 : f32 to vector<2x32xf32>
    %81 = arith.subf %80, %74 : vector<2x32xf32>
    %82 = arith.mulf %81, %79 : vector<2x32xf32>
    %83 = arith.mulf %74, %53 : vector<2x32xf32>
    %84 = arith.addf %82, %83 : vector<2x32xf32>
    %cst_56 = arith.constant dense<0.000000e+00> : vector<2x96xf32>
    %85 = tpu.matmul %84, %29, %cst_56 {dimension_numbers = #tpu.dot_dimension_numbers<[1], [0], [0], [1], [0, 0, 1, 1], [], []>} : vector<2x32xf32>, vector<32x96xf32>, vector<2x96xf32> -> vector<2x96xf32>
    %86 = arith.addf %85, %37 : vector<2x96xf32>
    %cst_57 = arith.constant dense<0.000000e+00> : vector<2x96xf32>
    %87 = tpu.matmul %55, %33, %cst_57 {dimension_numbers = #tpu.dot_dimension_numbers<[1], [0], [0], [1], [0, 0, 1, 1], [], []>} : vector<2x32xf32>, vector<32x96xf32>, vector<2x96xf32> -> vector<2x96xf32>
    %88 = arith.addf %87, %45 : vector<2x96xf32>
    %89 = vector.extract_strided_slice %86 {offsets = [0, 0], sizes = [2, 32], strides = [1, 1]} : vector<2x96xf32> to vector<2x32xf32>
    %90 = vector.extract_strided_slice %88 {offsets = [0, 0], sizes = [2, 32], strides = [1, 1]} : vector<2x96xf32> to vector<2x32xf32>
    %91 = arith.addf %89, %90 : vector<2x32xf32>
    %92 = arith.negf %91 : vector<2x32xf32>
    %93 = math.exp %92 : vector<2x32xf32>
    %cst_58 = arith.constant 1.000000e+00 : f32
    %94 = vector.broadcast %cst_58 : f32 to vector<2x32xf32>
    %95 = arith.addf %94, %93 : vector<2x32xf32>
    %96 = arith.divf %94, %95 : vector<2x32xf32>
    %97 = vector.extract_strided_slice %86 {offsets = [0, 32], sizes = [2, 32], strides = [1, 1]} : vector<2x96xf32> to vector<2x32xf32>
    %98 = vector.extract_strided_slice %88 {offsets = [0, 32], sizes = [2, 32], strides = [1, 1]} : vector<2x96xf32> to vector<2x32xf32>
    %99 = arith.addf %97, %98 : vector<2x32xf32>
    %100 = arith.negf %99 : vector<2x32xf32>
    %101 = math.exp %100 : vector<2x32xf32>
    %cst_59 = arith.constant 1.000000e+00 : f32
    %102 = vector.broadcast %cst_59 : f32 to vector<2x32xf32>
    %103 = arith.addf %102, %101 : vector<2x32xf32>
    %104 = arith.divf %102, %103 : vector<2x32xf32>
    %105 = vector.extract_strided_slice %86 {offsets = [0, 64], sizes = [2, 32], strides = [1, 1]} : vector<2x96xf32> to vector<2x32xf32>
    %106 = vector.extract_strided_slice %88 {offsets = [0, 64], sizes = [2, 32], strides = [1, 1]} : vector<2x96xf32> to vector<2x32xf32>
    %107 = arith.mulf %96, %106 : vector<2x32xf32>
    %108 = arith.addf %105, %107 : vector<2x32xf32>
    %109 = math.tanh %108 : vector<2x32xf32>
    %cst_60 = arith.constant 1.000000e+00 : f32
    %110 = vector.broadcast %cst_60 : f32 to vector<2x32xf32>
    %111 = arith.subf %110, %104 : vector<2x32xf32>
    %112 = arith.mulf %111, %109 : vector<2x32xf32>
    %113 = arith.mulf %104, %55 : vector<2x32xf32>
    %114 = arith.addf %112, %113 : vector<2x32xf32>
    %115 = vector.extract_strided_slice %51 {offsets = [2, 0], sizes = [2, 96], strides = [1, 1]} : vector<16x96xf32> to vector<2x96xf32>
    %cst_61 = arith.constant dense<0.000000e+00> : vector<2x96xf32>
    %116 = tpu.matmul %84, %31, %cst_61 {dimension_numbers = #tpu.dot_dimension_numbers<[1], [0], [0], [1], [0, 0, 1, 1], [], []>} : vector<2x32xf32>, vector<32x96xf32>, vector<2x96xf32> -> vector<2x96xf32>
    %117 = arith.addf %116, %41 : vector<2x96xf32>
    %118 = vector.extract_strided_slice %115 {offsets = [0, 0], sizes = [2, 32], strides = [1, 1]} : vector<2x96xf32> to vector<2x32xf32>
    %119 = vector.extract_strided_slice %117 {offsets = [0, 0], sizes = [2, 32], strides = [1, 1]} : vector<2x96xf32> to vector<2x32xf32>
    %120 = arith.addf %118, %119 : vector<2x32xf32>
    %121 = arith.negf %120 : vector<2x32xf32>
    %122 = math.exp %121 : vector<2x32xf32>
    %cst_62 = arith.constant 1.000000e+00 : f32
    %123 = vector.broadcast %cst_62 : f32 to vector<2x32xf32>
    %124 = arith.addf %123, %122 : vector<2x32xf32>
    %125 = arith.divf %123, %124 : vector<2x32xf32>
    %126 = vector.extract_strided_slice %115 {offsets = [0, 32], sizes = [2, 32], strides = [1, 1]} : vector<2x96xf32> to vector<2x32xf32>
    %127 = vector.extract_strided_slice %117 {offsets = [0, 32], sizes = [2, 32], strides = [1, 1]} : vector<2x96xf32> to vector<2x32xf32>
    %128 = arith.addf %126, %127 : vector<2x32xf32>
    %129 = arith.negf %128 : vector<2x32xf32>
    %130 = math.exp %129 : vector<2x32xf32>
    %cst_63 = arith.constant 1.000000e+00 : f32
    %131 = vector.broadcast %cst_63 : f32 to vector<2x32xf32>
    %132 = arith.addf %131, %130 : vector<2x32xf32>
    %133 = arith.divf %131, %132 : vector<2x32xf32>
    %134 = vector.extract_strided_slice %115 {offsets = [0, 64], sizes = [2, 32], strides = [1, 1]} : vector<2x96xf32> to vector<2x32xf32>
    %135 = vector.extract_strided_slice %117 {offsets = [0, 64], sizes = [2, 32], strides = [1, 1]} : vector<2x96xf32> to vector<2x32xf32>
    %136 = arith.mulf %125, %135 : vector<2x32xf32>
    %137 = arith.addf %134, %136 : vector<2x32xf32>
    %138 = math.tanh %137 : vector<2x32xf32>
    %cst_64 = arith.constant 1.000000e+00 : f32
    %139 = vector.broadcast %cst_64 : f32 to vector<2x32xf32>
    %140 = arith.subf %139, %133 : vector<2x32xf32>
    %141 = arith.mulf %140, %138 : vector<2x32xf32>
    %142 = arith.mulf %133, %84 : vector<2x32xf32>
    %143 = arith.addf %141, %142 : vector<2x32xf32>
    %cst_65 = arith.constant dense<0.000000e+00> : vector<2x96xf32>
    %144 = tpu.matmul %143, %29, %cst_65 {dimension_numbers = #tpu.dot_dimension_numbers<[1], [0], [0], [1], [0, 0, 1, 1], [], []>} : vector<2x32xf32>, vector<32x96xf32>, vector<2x96xf32> -> vector<2x96xf32>
    %145 = arith.addf %144, %37 : vector<2x96xf32>
    %cst_66 = arith.constant dense<0.000000e+00> : vector<2x96xf32>
    %146 = tpu.matmul %114, %33, %cst_66 {dimension_numbers = #tpu.dot_dimension_numbers<[1], [0], [0], [1], [0, 0, 1, 1], [], []>} : vector<2x32xf32>, vector<32x96xf32>, vector<2x96xf32> -> vector<2x96xf32>
    %147 = arith.addf %146, %45 : vector<2x96xf32>
    %148 = vector.extract_strided_slice %145 {offsets = [0, 0], sizes = [2, 32], strides = [1, 1]} : vector<2x96xf32> to vector<2x32xf32>
    %149 = vector.extract_strided_slice %147 {offsets = [0, 0], sizes = [2, 32], strides = [1, 1]} : vector<2x96xf32> to vector<2x32xf32>
    %150 = arith.addf %148, %149 : vector<2x32xf32>
    %151 = arith.negf %150 : vector<2x32xf32>
    %152 = math.exp %151 : vector<2x32xf32>
    %cst_67 = arith.constant 1.000000e+00 : f32
    %153 = vector.broadcast %cst_67 : f32 to vector<2x32xf32>
    %154 = arith.addf %153, %152 : vector<2x32xf32>
    %155 = arith.divf %153, %154 : vector<2x32xf32>
    %156 = vector.extract_strided_slice %145 {offsets = [0, 32], sizes = [2, 32], strides = [1, 1]} : vector<2x96xf32> to vector<2x32xf32>
    %157 = vector.extract_strided_slice %147 {offsets = [0, 32], sizes = [2, 32], strides = [1, 1]} : vector<2x96xf32> to vector<2x32xf32>
    %158 = arith.addf %156, %157 : vector<2x32xf32>
    %159 = arith.negf %158 : vector<2x32xf32>
    %160 = math.exp %159 : vector<2x32xf32>
    %cst_68 = arith.constant 1.000000e+00 : f32
    %161 = vector.broadcast %cst_68 : f32 to vector<2x32xf32>
    %162 = arith.addf %161, %160 : vector<2x32xf32>
    %163 = arith.divf %161, %162 : vector<2x32xf32>
    %164 = vector.extract_strided_slice %145 {offsets = [0, 64], sizes = [2, 32], strides = [1, 1]} : vector<2x96xf32> to vector<2x32xf32>
    %165 = vector.extract_strided_slice %147 {offsets = [0, 64], sizes = [2, 32], strides = [1, 1]} : vector<2x96xf32> to vector<2x32xf32>
    %166 = arith.mulf %155, %165 : vector<2x32xf32>
    %167 = arith.addf %164, %166 : vector<2x32xf32>
    %168 = math.tanh %167 : vector<2x32xf32>
    %cst_69 = arith.constant 1.000000e+00 : f32
    %169 = vector.broadcast %cst_69 : f32 to vector<2x32xf32>
    %170 = arith.subf %169, %163 : vector<2x32xf32>
    %171 = arith.mulf %170, %168 : vector<2x32xf32>
    %172 = arith.mulf %163, %114 : vector<2x32xf32>
    %173 = arith.addf %171, %172 : vector<2x32xf32>
    %174 = vector.extract_strided_slice %51 {offsets = [4, 0], sizes = [2, 96], strides = [1, 1]} : vector<16x96xf32> to vector<2x96xf32>
    %cst_70 = arith.constant dense<0.000000e+00> : vector<2x96xf32>
    %175 = tpu.matmul %143, %31, %cst_70 {dimension_numbers = #tpu.dot_dimension_numbers<[1], [0], [0], [1], [0, 0, 1, 1], [], []>} : vector<2x32xf32>, vector<32x96xf32>, vector<2x96xf32> -> vector<2x96xf32>
    %176 = arith.addf %175, %41 : vector<2x96xf32>
    %177 = vector.extract_strided_slice %174 {offsets = [0, 0], sizes = [2, 32], strides = [1, 1]} : vector<2x96xf32> to vector<2x32xf32>
    %178 = vector.extract_strided_slice %176 {offsets = [0, 0], sizes = [2, 32], strides = [1, 1]} : vector<2x96xf32> to vector<2x32xf32>
    %179 = arith.addf %177, %178 : vector<2x32xf32>
    %180 = arith.negf %179 : vector<2x32xf32>
    %181 = math.exp %180 : vector<2x32xf32>
    %cst_71 = arith.constant 1.000000e+00 : f32
    %182 = vector.broadcast %cst_71 : f32 to vector<2x32xf32>
    %183 = arith.addf %182, %181 : vector<2x32xf32>
    %184 = arith.divf %182, %183 : vector<2x32xf32>
    %185 = vector.extract_strided_slice %174 {offsets = [0, 32], sizes = [2, 32], strides = [1, 1]} : vector<2x96xf32> to vector<2x32xf32>
    %186 = vector.extract_strided_slice %176 {offsets = [0, 32], sizes = [2, 32], strides = [1, 1]} : vector<2x96xf32> to vector<2x32xf32>
    %187 = arith.addf %185, %186 : vector<2x32xf32>
    %188 = arith.negf %187 : vector<2x32xf32>
    %189 = math.exp %188 : vector<2x32xf32>
    %cst_72 = arith.constant 1.000000e+00 : f32
    %190 = vector.broadcast %cst_72 : f32 to vector<2x32xf32>
    %191 = arith.addf %190, %189 : vector<2x32xf32>
    %192 = arith.divf %190, %191 : vector<2x32xf32>
    %193 = vector.extract_strided_slice %174 {offsets = [0, 64], sizes = [2, 32], strides = [1, 1]} : vector<2x96xf32> to vector<2x32xf32>
    %194 = vector.extract_strided_slice %176 {offsets = [0, 64], sizes = [2, 32], strides = [1, 1]} : vector<2x96xf32> to vector<2x32xf32>
    %195 = arith.mulf %184, %194 : vector<2x32xf32>
    %196 = arith.addf %193, %195 : vector<2x32xf32>
    %197 = math.tanh %196 : vector<2x32xf32>
    %cst_73 = arith.constant 1.000000e+00 : f32
    %198 = vector.broadcast %cst_73 : f32 to vector<2x32xf32>
    %199 = arith.subf %198, %192 : vector<2x32xf32>
    %200 = arith.mulf %199, %197 : vector<2x32xf32>
    %201 = arith.mulf %192, %143 : vector<2x32xf32>
    %202 = arith.addf %200, %201 : vector<2x32xf32>
    %cst_74 = arith.constant dense<0.000000e+00> : vector<2x96xf32>
    %203 = tpu.matmul %202, %29, %cst_74 {dimension_numbers = #tpu.dot_dimension_numbers<[1], [0], [0], [1], [0, 0, 1, 1], [], []>} : vector<2x32xf32>, vector<32x96xf32>, vector<2x96xf32> -> vector<2x96xf32>
    %204 = arith.addf %203, %37 : vector<2x96xf32>
    %cst_75 = arith.constant dense<0.000000e+00> : vector<2x96xf32>
    %205 = tpu.matmul %173, %33, %cst_75 {dimension_numbers = #tpu.dot_dimension_numbers<[1], [0], [0], [1], [0, 0, 1, 1], [], []>} : vector<2x32xf32>, vector<32x96xf32>, vector<2x96xf32> -> vector<2x96xf32>
    %206 = arith.addf %205, %45 : vector<2x96xf32>
    %207 = vector.extract_strided_slice %204 {offsets = [0, 0], sizes = [2, 32], strides = [1, 1]} : vector<2x96xf32> to vector<2x32xf32>
    %208 = vector.extract_strided_slice %206 {offsets = [0, 0], sizes = [2, 32], strides = [1, 1]} : vector<2x96xf32> to vector<2x32xf32>
    %209 = arith.addf %207, %208 : vector<2x32xf32>
    %210 = arith.negf %209 : vector<2x32xf32>
    %211 = math.exp %210 : vector<2x32xf32>
    %cst_76 = arith.constant 1.000000e+00 : f32
    %212 = vector.broadcast %cst_76 : f32 to vector<2x32xf32>
    %213 = arith.addf %212, %211 : vector<2x32xf32>
    %214 = arith.divf %212, %213 : vector<2x32xf32>
    %215 = vector.extract_strided_slice %204 {offsets = [0, 32], sizes = [2, 32], strides = [1, 1]} : vector<2x96xf32> to vector<2x32xf32>
    %216 = vector.extract_strided_slice %206 {offsets = [0, 32], sizes = [2, 32], strides = [1, 1]} : vector<2x96xf32> to vector<2x32xf32>
    %217 = arith.addf %215, %216 : vector<2x32xf32>
    %218 = arith.negf %217 : vector<2x32xf32>
    %219 = math.exp %218 : vector<2x32xf32>
    %cst_77 = arith.constant 1.000000e+00 : f32
    %220 = vector.broadcast %cst_77 : f32 to vector<2x32xf32>
    %221 = arith.addf %220, %219 : vector<2x32xf32>
    %222 = arith.divf %220, %221 : vector<2x32xf32>
    %223 = vector.extract_strided_slice %204 {offsets = [0, 64], sizes = [2, 32], strides = [1, 1]} : vector<2x96xf32> to vector<2x32xf32>
    %224 = vector.extract_strided_slice %206 {offsets = [0, 64], sizes = [2, 32], strides = [1, 1]} : vector<2x96xf32> to vector<2x32xf32>
    %225 = arith.mulf %214, %224 : vector<2x32xf32>
    %226 = arith.addf %223, %225 : vector<2x32xf32>
    %227 = math.tanh %226 : vector<2x32xf32>
    %cst_78 = arith.constant 1.000000e+00 : f32
    %228 = vector.broadcast %cst_78 : f32 to vector<2x32xf32>
    %229 = arith.subf %228, %222 : vector<2x32xf32>
    %230 = arith.mulf %229, %227 : vector<2x32xf32>
    %231 = arith.mulf %222, %173 : vector<2x32xf32>
    %232 = arith.addf %230, %231 : vector<2x32xf32>
    %233 = vector.extract_strided_slice %51 {offsets = [6, 0], sizes = [2, 96], strides = [1, 1]} : vector<16x96xf32> to vector<2x96xf32>
    %cst_79 = arith.constant dense<0.000000e+00> : vector<2x96xf32>
    %234 = tpu.matmul %202, %31, %cst_79 {dimension_numbers = #tpu.dot_dimension_numbers<[1], [0], [0], [1], [0, 0, 1, 1], [], []>} : vector<2x32xf32>, vector<32x96xf32>, vector<2x96xf32> -> vector<2x96xf32>
    %235 = arith.addf %234, %41 : vector<2x96xf32>
    %236 = vector.extract_strided_slice %233 {offsets = [0, 0], sizes = [2, 32], strides = [1, 1]} : vector<2x96xf32> to vector<2x32xf32>
    %237 = vector.extract_strided_slice %235 {offsets = [0, 0], sizes = [2, 32], strides = [1, 1]} : vector<2x96xf32> to vector<2x32xf32>
    %238 = arith.addf %236, %237 : vector<2x32xf32>
    %239 = arith.negf %238 : vector<2x32xf32>
    %240 = math.exp %239 : vector<2x32xf32>
    %cst_80 = arith.constant 1.000000e+00 : f32
    %241 = vector.broadcast %cst_80 : f32 to vector<2x32xf32>
    %242 = arith.addf %241, %240 : vector<2x32xf32>
    %243 = arith.divf %241, %242 : vector<2x32xf32>
    %244 = vector.extract_strided_slice %233 {offsets = [0, 32], sizes = [2, 32], strides = [1, 1]} : vector<2x96xf32> to vector<2x32xf32>
    %245 = vector.extract_strided_slice %235 {offsets = [0, 32], sizes = [2, 32], strides = [1, 1]} : vector<2x96xf32> to vector<2x32xf32>
    %246 = arith.addf %244, %245 : vector<2x32xf32>
    %247 = arith.negf %246 : vector<2x32xf32>
    %248 = math.exp %247 : vector<2x32xf32>
    %cst_81 = arith.constant 1.000000e+00 : f32
    %249 = vector.broadcast %cst_81 : f32 to vector<2x32xf32>
    %250 = arith.addf %249, %248 : vector<2x32xf32>
    %251 = arith.divf %249, %250 : vector<2x32xf32>
    %252 = vector.extract_strided_slice %233 {offsets = [0, 64], sizes = [2, 32], strides = [1, 1]} : vector<2x96xf32> to vector<2x32xf32>
    %253 = vector.extract_strided_slice %235 {offsets = [0, 64], sizes = [2, 32], strides = [1, 1]} : vector<2x96xf32> to vector<2x32xf32>
    %254 = arith.mulf %243, %253 : vector<2x32xf32>
    %255 = arith.addf %252, %254 : vector<2x32xf32>
    %256 = math.tanh %255 : vector<2x32xf32>
    %cst_82 = arith.constant 1.000000e+00 : f32
    %257 = vector.broadcast %cst_82 : f32 to vector<2x32xf32>
    %258 = arith.subf %257, %251 : vector<2x32xf32>
    %259 = arith.mulf %258, %256 : vector<2x32xf32>
    %260 = arith.mulf %251, %202 : vector<2x32xf32>
    %261 = arith.addf %259, %260 : vector<2x32xf32>
    %cst_83 = arith.constant dense<0.000000e+00> : vector<2x96xf32>
    %262 = tpu.matmul %261, %29, %cst_83 {dimension_numbers = #tpu.dot_dimension_numbers<[1], [0], [0], [1], [0, 0, 1, 1], [], []>} : vector<2x32xf32>, vector<32x96xf32>, vector<2x96xf32> -> vector<2x96xf32>
    %263 = arith.addf %262, %37 : vector<2x96xf32>
    %cst_84 = arith.constant dense<0.000000e+00> : vector<2x96xf32>
    %264 = tpu.matmul %232, %33, %cst_84 {dimension_numbers = #tpu.dot_dimension_numbers<[1], [0], [0], [1], [0, 0, 1, 1], [], []>} : vector<2x32xf32>, vector<32x96xf32>, vector<2x96xf32> -> vector<2x96xf32>
    %265 = arith.addf %264, %45 : vector<2x96xf32>
    %266 = vector.extract_strided_slice %263 {offsets = [0, 0], sizes = [2, 32], strides = [1, 1]} : vector<2x96xf32> to vector<2x32xf32>
    %267 = vector.extract_strided_slice %265 {offsets = [0, 0], sizes = [2, 32], strides = [1, 1]} : vector<2x96xf32> to vector<2x32xf32>
    %268 = arith.addf %266, %267 : vector<2x32xf32>
    %269 = arith.negf %268 : vector<2x32xf32>
    %270 = math.exp %269 : vector<2x32xf32>
    %cst_85 = arith.constant 1.000000e+00 : f32
    %271 = vector.broadcast %cst_85 : f32 to vector<2x32xf32>
    %272 = arith.addf %271, %270 : vector<2x32xf32>
    %273 = arith.divf %271, %272 : vector<2x32xf32>
    %274 = vector.extract_strided_slice %263 {offsets = [0, 32], sizes = [2, 32], strides = [1, 1]} : vector<2x96xf32> to vector<2x32xf32>
    %275 = vector.extract_strided_slice %265 {offsets = [0, 32], sizes = [2, 32], strides = [1, 1]} : vector<2x96xf32> to vector<2x32xf32>
    %276 = arith.addf %274, %275 : vector<2x32xf32>
    %277 = arith.negf %276 : vector<2x32xf32>
    %278 = math.exp %277 : vector<2x32xf32>
    %cst_86 = arith.constant 1.000000e+00 : f32
    %279 = vector.broadcast %cst_86 : f32 to vector<2x32xf32>
    %280 = arith.addf %279, %278 : vector<2x32xf32>
    %281 = arith.divf %279, %280 : vector<2x32xf32>
    %282 = vector.extract_strided_slice %263 {offsets = [0, 64], sizes = [2, 32], strides = [1, 1]} : vector<2x96xf32> to vector<2x32xf32>
    %283 = vector.extract_strided_slice %265 {offsets = [0, 64], sizes = [2, 32], strides = [1, 1]} : vector<2x96xf32> to vector<2x32xf32>
    %284 = arith.mulf %273, %283 : vector<2x32xf32>
    %285 = arith.addf %282, %284 : vector<2x32xf32>
    %286 = math.tanh %285 : vector<2x32xf32>
    %cst_87 = arith.constant 1.000000e+00 : f32
    %287 = vector.broadcast %cst_87 : f32 to vector<2x32xf32>
    %288 = arith.subf %287, %281 : vector<2x32xf32>
    %289 = arith.mulf %288, %286 : vector<2x32xf32>
    %290 = arith.mulf %281, %232 : vector<2x32xf32>
    %291 = arith.addf %289, %290 : vector<2x32xf32>
    %292 = vector.extract_strided_slice %51 {offsets = [8, 0], sizes = [2, 96], strides = [1, 1]} : vector<16x96xf32> to vector<2x96xf32>
    %cst_88 = arith.constant dense<0.000000e+00> : vector<2x96xf32>
    %293 = tpu.matmul %261, %31, %cst_88 {dimension_numbers = #tpu.dot_dimension_numbers<[1], [0], [0], [1], [0, 0, 1, 1], [], []>} : vector<2x32xf32>, vector<32x96xf32>, vector<2x96xf32> -> vector<2x96xf32>
    %294 = arith.addf %293, %41 : vector<2x96xf32>
    %295 = vector.extract_strided_slice %292 {offsets = [0, 0], sizes = [2, 32], strides = [1, 1]} : vector<2x96xf32> to vector<2x32xf32>
    %296 = vector.extract_strided_slice %294 {offsets = [0, 0], sizes = [2, 32], strides = [1, 1]} : vector<2x96xf32> to vector<2x32xf32>
    %297 = arith.addf %295, %296 : vector<2x32xf32>
    %298 = arith.negf %297 : vector<2x32xf32>
    %299 = math.exp %298 : vector<2x32xf32>
    %cst_89 = arith.constant 1.000000e+00 : f32
    %300 = vector.broadcast %cst_89 : f32 to vector<2x32xf32>
    %301 = arith.addf %300, %299 : vector<2x32xf32>
    %302 = arith.divf %300, %301 : vector<2x32xf32>
    %303 = vector.extract_strided_slice %292 {offsets = [0, 32], sizes = [2, 32], strides = [1, 1]} : vector<2x96xf32> to vector<2x32xf32>
    %304 = vector.extract_strided_slice %294 {offsets = [0, 32], sizes = [2, 32], strides = [1, 1]} : vector<2x96xf32> to vector<2x32xf32>
    %305 = arith.addf %303, %304 : vector<2x32xf32>
    %306 = arith.negf %305 : vector<2x32xf32>
    %307 = math.exp %306 : vector<2x32xf32>
    %cst_90 = arith.constant 1.000000e+00 : f32
    %308 = vector.broadcast %cst_90 : f32 to vector<2x32xf32>
    %309 = arith.addf %308, %307 : vector<2x32xf32>
    %310 = arith.divf %308, %309 : vector<2x32xf32>
    %311 = vector.extract_strided_slice %292 {offsets = [0, 64], sizes = [2, 32], strides = [1, 1]} : vector<2x96xf32> to vector<2x32xf32>
    %312 = vector.extract_strided_slice %294 {offsets = [0, 64], sizes = [2, 32], strides = [1, 1]} : vector<2x96xf32> to vector<2x32xf32>
    %313 = arith.mulf %302, %312 : vector<2x32xf32>
    %314 = arith.addf %311, %313 : vector<2x32xf32>
    %315 = math.tanh %314 : vector<2x32xf32>
    %cst_91 = arith.constant 1.000000e+00 : f32
    %316 = vector.broadcast %cst_91 : f32 to vector<2x32xf32>
    %317 = arith.subf %316, %310 : vector<2x32xf32>
    %318 = arith.mulf %317, %315 : vector<2x32xf32>
    %319 = arith.mulf %310, %261 : vector<2x32xf32>
    %320 = arith.addf %318, %319 : vector<2x32xf32>
    %cst_92 = arith.constant dense<0.000000e+00> : vector<2x96xf32>
    %321 = tpu.matmul %320, %29, %cst_92 {dimension_numbers = #tpu.dot_dimension_numbers<[1], [0], [0], [1], [0, 0, 1, 1], [], []>} : vector<2x32xf32>, vector<32x96xf32>, vector<2x96xf32> -> vector<2x96xf32>
    %322 = arith.addf %321, %37 : vector<2x96xf32>
    %cst_93 = arith.constant dense<0.000000e+00> : vector<2x96xf32>
    %323 = tpu.matmul %291, %33, %cst_93 {dimension_numbers = #tpu.dot_dimension_numbers<[1], [0], [0], [1], [0, 0, 1, 1], [], []>} : vector<2x32xf32>, vector<32x96xf32>, vector<2x96xf32> -> vector<2x96xf32>
    %324 = arith.addf %323, %45 : vector<2x96xf32>
    %325 = vector.extract_strided_slice %322 {offsets = [0, 0], sizes = [2, 32], strides = [1, 1]} : vector<2x96xf32> to vector<2x32xf32>
    %326 = vector.extract_strided_slice %324 {offsets = [0, 0], sizes = [2, 32], strides = [1, 1]} : vector<2x96xf32> to vector<2x32xf32>
    %327 = arith.addf %325, %326 : vector<2x32xf32>
    %328 = arith.negf %327 : vector<2x32xf32>
    %329 = math.exp %328 : vector<2x32xf32>
    %cst_94 = arith.constant 1.000000e+00 : f32
    %330 = vector.broadcast %cst_94 : f32 to vector<2x32xf32>
    %331 = arith.addf %330, %329 : vector<2x32xf32>
    %332 = arith.divf %330, %331 : vector<2x32xf32>
    %333 = vector.extract_strided_slice %322 {offsets = [0, 32], sizes = [2, 32], strides = [1, 1]} : vector<2x96xf32> to vector<2x32xf32>
    %334 = vector.extract_strided_slice %324 {offsets = [0, 32], sizes = [2, 32], strides = [1, 1]} : vector<2x96xf32> to vector<2x32xf32>
    %335 = arith.addf %333, %334 : vector<2x32xf32>
    %336 = arith.negf %335 : vector<2x32xf32>
    %337 = math.exp %336 : vector<2x32xf32>
    %cst_95 = arith.constant 1.000000e+00 : f32
    %338 = vector.broadcast %cst_95 : f32 to vector<2x32xf32>
    %339 = arith.addf %338, %337 : vector<2x32xf32>
    %340 = arith.divf %338, %339 : vector<2x32xf32>
    %341 = vector.extract_strided_slice %322 {offsets = [0, 64], sizes = [2, 32], strides = [1, 1]} : vector<2x96xf32> to vector<2x32xf32>
    %342 = vector.extract_strided_slice %324 {offsets = [0, 64], sizes = [2, 32], strides = [1, 1]} : vector<2x96xf32> to vector<2x32xf32>
    %343 = arith.mulf %332, %342 : vector<2x32xf32>
    %344 = arith.addf %341, %343 : vector<2x32xf32>
    %345 = math.tanh %344 : vector<2x32xf32>
    %cst_96 = arith.constant 1.000000e+00 : f32
    %346 = vector.broadcast %cst_96 : f32 to vector<2x32xf32>
    %347 = arith.subf %346, %340 : vector<2x32xf32>
    %348 = arith.mulf %347, %345 : vector<2x32xf32>
    %349 = arith.mulf %340, %291 : vector<2x32xf32>
    %350 = arith.addf %348, %349 : vector<2x32xf32>
    %351 = vector.extract_strided_slice %51 {offsets = [10, 0], sizes = [2, 96], strides = [1, 1]} : vector<16x96xf32> to vector<2x96xf32>
    %cst_97 = arith.constant dense<0.000000e+00> : vector<2x96xf32>
    %352 = tpu.matmul %320, %31, %cst_97 {dimension_numbers = #tpu.dot_dimension_numbers<[1], [0], [0], [1], [0, 0, 1, 1], [], []>} : vector<2x32xf32>, vector<32x96xf32>, vector<2x96xf32> -> vector<2x96xf32>
    %353 = arith.addf %352, %41 : vector<2x96xf32>
    %354 = vector.extract_strided_slice %351 {offsets = [0, 0], sizes = [2, 32], strides = [1, 1]} : vector<2x96xf32> to vector<2x32xf32>
    %355 = vector.extract_strided_slice %353 {offsets = [0, 0], sizes = [2, 32], strides = [1, 1]} : vector<2x96xf32> to vector<2x32xf32>
    %356 = arith.addf %354, %355 : vector<2x32xf32>
    %357 = arith.negf %356 : vector<2x32xf32>
    %358 = math.exp %357 : vector<2x32xf32>
    %cst_98 = arith.constant 1.000000e+00 : f32
    %359 = vector.broadcast %cst_98 : f32 to vector<2x32xf32>
    %360 = arith.addf %359, %358 : vector<2x32xf32>
    %361 = arith.divf %359, %360 : vector<2x32xf32>
    %362 = vector.extract_strided_slice %351 {offsets = [0, 32], sizes = [2, 32], strides = [1, 1]} : vector<2x96xf32> to vector<2x32xf32>
    %363 = vector.extract_strided_slice %353 {offsets = [0, 32], sizes = [2, 32], strides = [1, 1]} : vector<2x96xf32> to vector<2x32xf32>
    %364 = arith.addf %362, %363 : vector<2x32xf32>
    %365 = arith.negf %364 : vector<2x32xf32>
    %366 = math.exp %365 : vector<2x32xf32>
    %cst_99 = arith.constant 1.000000e+00 : f32
    %367 = vector.broadcast %cst_99 : f32 to vector<2x32xf32>
    %368 = arith.addf %367, %366 : vector<2x32xf32>
    %369 = arith.divf %367, %368 : vector<2x32xf32>
    %370 = vector.extract_strided_slice %351 {offsets = [0, 64], sizes = [2, 32], strides = [1, 1]} : vector<2x96xf32> to vector<2x32xf32>
    %371 = vector.extract_strided_slice %353 {offsets = [0, 64], sizes = [2, 32], strides = [1, 1]} : vector<2x96xf32> to vector<2x32xf32>
    %372 = arith.mulf %361, %371 : vector<2x32xf32>
    %373 = arith.addf %370, %372 : vector<2x32xf32>
    %374 = math.tanh %373 : vector<2x32xf32>
    %cst_100 = arith.constant 1.000000e+00 : f32
    %375 = vector.broadcast %cst_100 : f32 to vector<2x32xf32>
    %376 = arith.subf %375, %369 : vector<2x32xf32>
    %377 = arith.mulf %376, %374 : vector<2x32xf32>
    %378 = arith.mulf %369, %320 : vector<2x32xf32>
    %379 = arith.addf %377, %378 : vector<2x32xf32>
    %cst_101 = arith.constant dense<0.000000e+00> : vector<2x96xf32>
    %380 = tpu.matmul %379, %29, %cst_101 {dimension_numbers = #tpu.dot_dimension_numbers<[1], [0], [0], [1], [0, 0, 1, 1], [], []>} : vector<2x32xf32>, vector<32x96xf32>, vector<2x96xf32> -> vector<2x96xf32>
    %381 = arith.addf %380, %37 : vector<2x96xf32>
    %cst_102 = arith.constant dense<0.000000e+00> : vector<2x96xf32>
    %382 = tpu.matmul %350, %33, %cst_102 {dimension_numbers = #tpu.dot_dimension_numbers<[1], [0], [0], [1], [0, 0, 1, 1], [], []>} : vector<2x32xf32>, vector<32x96xf32>, vector<2x96xf32> -> vector<2x96xf32>
    %383 = arith.addf %382, %45 : vector<2x96xf32>
    %384 = vector.extract_strided_slice %381 {offsets = [0, 0], sizes = [2, 32], strides = [1, 1]} : vector<2x96xf32> to vector<2x32xf32>
    %385 = vector.extract_strided_slice %383 {offsets = [0, 0], sizes = [2, 32], strides = [1, 1]} : vector<2x96xf32> to vector<2x32xf32>
    %386 = arith.addf %384, %385 : vector<2x32xf32>
    %387 = arith.negf %386 : vector<2x32xf32>
    %388 = math.exp %387 : vector<2x32xf32>
    %cst_103 = arith.constant 1.000000e+00 : f32
    %389 = vector.broadcast %cst_103 : f32 to vector<2x32xf32>
    %390 = arith.addf %389, %388 : vector<2x32xf32>
    %391 = arith.divf %389, %390 : vector<2x32xf32>
    %392 = vector.extract_strided_slice %381 {offsets = [0, 32], sizes = [2, 32], strides = [1, 1]} : vector<2x96xf32> to vector<2x32xf32>
    %393 = vector.extract_strided_slice %383 {offsets = [0, 32], sizes = [2, 32], strides = [1, 1]} : vector<2x96xf32> to vector<2x32xf32>
    %394 = arith.addf %392, %393 : vector<2x32xf32>
    %395 = arith.negf %394 : vector<2x32xf32>
    %396 = math.exp %395 : vector<2x32xf32>
    %cst_104 = arith.constant 1.000000e+00 : f32
    %397 = vector.broadcast %cst_104 : f32 to vector<2x32xf32>
    %398 = arith.addf %397, %396 : vector<2x32xf32>
    %399 = arith.divf %397, %398 : vector<2x32xf32>
    %400 = vector.extract_strided_slice %381 {offsets = [0, 64], sizes = [2, 32], strides = [1, 1]} : vector<2x96xf32> to vector<2x32xf32>
    %401 = vector.extract_strided_slice %383 {offsets = [0, 64], sizes = [2, 32], strides = [1, 1]} : vector<2x96xf32> to vector<2x32xf32>
    %402 = arith.mulf %391, %401 : vector<2x32xf32>
    %403 = arith.addf %400, %402 : vector<2x32xf32>
    %404 = math.tanh %403 : vector<2x32xf32>
    %cst_105 = arith.constant 1.000000e+00 : f32
    %405 = vector.broadcast %cst_105 : f32 to vector<2x32xf32>
    %406 = arith.subf %405, %399 : vector<2x32xf32>
    %407 = arith.mulf %406, %404 : vector<2x32xf32>
    %408 = arith.mulf %399, %350 : vector<2x32xf32>
    %409 = arith.addf %407, %408 : vector<2x32xf32>
    %410 = vector.extract_strided_slice %51 {offsets = [12, 0], sizes = [2, 96], strides = [1, 1]} : vector<16x96xf32> to vector<2x96xf32>
    %cst_106 = arith.constant dense<0.000000e+00> : vector<2x96xf32>
    %411 = tpu.matmul %379, %31, %cst_106 {dimension_numbers = #tpu.dot_dimension_numbers<[1], [0], [0], [1], [0, 0, 1, 1], [], []>} : vector<2x32xf32>, vector<32x96xf32>, vector<2x96xf32> -> vector<2x96xf32>
    %412 = arith.addf %411, %41 : vector<2x96xf32>
    %413 = vector.extract_strided_slice %410 {offsets = [0, 0], sizes = [2, 32], strides = [1, 1]} : vector<2x96xf32> to vector<2x32xf32>
    %414 = vector.extract_strided_slice %412 {offsets = [0, 0], sizes = [2, 32], strides = [1, 1]} : vector<2x96xf32> to vector<2x32xf32>
    %415 = arith.addf %413, %414 : vector<2x32xf32>
    %416 = arith.negf %415 : vector<2x32xf32>
    %417 = math.exp %416 : vector<2x32xf32>
    %cst_107 = arith.constant 1.000000e+00 : f32
    %418 = vector.broadcast %cst_107 : f32 to vector<2x32xf32>
    %419 = arith.addf %418, %417 : vector<2x32xf32>
    %420 = arith.divf %418, %419 : vector<2x32xf32>
    %421 = vector.extract_strided_slice %410 {offsets = [0, 32], sizes = [2, 32], strides = [1, 1]} : vector<2x96xf32> to vector<2x32xf32>
    %422 = vector.extract_strided_slice %412 {offsets = [0, 32], sizes = [2, 32], strides = [1, 1]} : vector<2x96xf32> to vector<2x32xf32>
    %423 = arith.addf %421, %422 : vector<2x32xf32>
    %424 = arith.negf %423 : vector<2x32xf32>
    %425 = math.exp %424 : vector<2x32xf32>
    %cst_108 = arith.constant 1.000000e+00 : f32
    %426 = vector.broadcast %cst_108 : f32 to vector<2x32xf32>
    %427 = arith.addf %426, %425 : vector<2x32xf32>
    %428 = arith.divf %426, %427 : vector<2x32xf32>
    %429 = vector.extract_strided_slice %410 {offsets = [0, 64], sizes = [2, 32], strides = [1, 1]} : vector<2x96xf32> to vector<2x32xf32>
    %430 = vector.extract_strided_slice %412 {offsets = [0, 64], sizes = [2, 32], strides = [1, 1]} : vector<2x96xf32> to vector<2x32xf32>
    %431 = arith.mulf %420, %430 : vector<2x32xf32>
    %432 = arith.addf %429, %431 : vector<2x32xf32>
    %433 = math.tanh %432 : vector<2x32xf32>
    %cst_109 = arith.constant 1.000000e+00 : f32
    %434 = vector.broadcast %cst_109 : f32 to vector<2x32xf32>
    %435 = arith.subf %434, %428 : vector<2x32xf32>
    %436 = arith.mulf %435, %433 : vector<2x32xf32>
    %437 = arith.mulf %428, %379 : vector<2x32xf32>
    %438 = arith.addf %436, %437 : vector<2x32xf32>
    %cst_110 = arith.constant dense<0.000000e+00> : vector<2x96xf32>
    %439 = tpu.matmul %438, %29, %cst_110 {dimension_numbers = #tpu.dot_dimension_numbers<[1], [0], [0], [1], [0, 0, 1, 1], [], []>} : vector<2x32xf32>, vector<32x96xf32>, vector<2x96xf32> -> vector<2x96xf32>
    %440 = arith.addf %439, %37 : vector<2x96xf32>
    %cst_111 = arith.constant dense<0.000000e+00> : vector<2x96xf32>
    %441 = tpu.matmul %409, %33, %cst_111 {dimension_numbers = #tpu.dot_dimension_numbers<[1], [0], [0], [1], [0, 0, 1, 1], [], []>} : vector<2x32xf32>, vector<32x96xf32>, vector<2x96xf32> -> vector<2x96xf32>
    %442 = arith.addf %441, %45 : vector<2x96xf32>
    %443 = vector.extract_strided_slice %440 {offsets = [0, 0], sizes = [2, 32], strides = [1, 1]} : vector<2x96xf32> to vector<2x32xf32>
    %444 = vector.extract_strided_slice %442 {offsets = [0, 0], sizes = [2, 32], strides = [1, 1]} : vector<2x96xf32> to vector<2x32xf32>
    %445 = arith.addf %443, %444 : vector<2x32xf32>
    %446 = arith.negf %445 : vector<2x32xf32>
    %447 = math.exp %446 : vector<2x32xf32>
    %cst_112 = arith.constant 1.000000e+00 : f32
    %448 = vector.broadcast %cst_112 : f32 to vector<2x32xf32>
    %449 = arith.addf %448, %447 : vector<2x32xf32>
    %450 = arith.divf %448, %449 : vector<2x32xf32>
    %451 = vector.extract_strided_slice %440 {offsets = [0, 32], sizes = [2, 32], strides = [1, 1]} : vector<2x96xf32> to vector<2x32xf32>
    %452 = vector.extract_strided_slice %442 {offsets = [0, 32], sizes = [2, 32], strides = [1, 1]} : vector<2x96xf32> to vector<2x32xf32>
    %453 = arith.addf %451, %452 : vector<2x32xf32>
    %454 = arith.negf %453 : vector<2x32xf32>
    %455 = math.exp %454 : vector<2x32xf32>
    %cst_113 = arith.constant 1.000000e+00 : f32
    %456 = vector.broadcast %cst_113 : f32 to vector<2x32xf32>
    %457 = arith.addf %456, %455 : vector<2x32xf32>
    %458 = arith.divf %456, %457 : vector<2x32xf32>
    %459 = vector.extract_strided_slice %440 {offsets = [0, 64], sizes = [2, 32], strides = [1, 1]} : vector<2x96xf32> to vector<2x32xf32>
    %460 = vector.extract_strided_slice %442 {offsets = [0, 64], sizes = [2, 32], strides = [1, 1]} : vector<2x96xf32> to vector<2x32xf32>
    %461 = arith.mulf %450, %460 : vector<2x32xf32>
    %462 = arith.addf %459, %461 : vector<2x32xf32>
    %463 = math.tanh %462 : vector<2x32xf32>
    %cst_114 = arith.constant 1.000000e+00 : f32
    %464 = vector.broadcast %cst_114 : f32 to vector<2x32xf32>
    %465 = arith.subf %464, %458 : vector<2x32xf32>
    %466 = arith.mulf %465, %463 : vector<2x32xf32>
    %467 = arith.mulf %458, %409 : vector<2x32xf32>
    %468 = arith.addf %466, %467 : vector<2x32xf32>
    %469 = vector.extract_strided_slice %51 {offsets = [14, 0], sizes = [2, 96], strides = [1, 1]} : vector<16x96xf32> to vector<2x96xf32>
    %cst_115 = arith.constant dense<0.000000e+00> : vector<2x96xf32>
    %470 = tpu.matmul %438, %31, %cst_115 {dimension_numbers = #tpu.dot_dimension_numbers<[1], [0], [0], [1], [0, 0, 1, 1], [], []>} : vector<2x32xf32>, vector<32x96xf32>, vector<2x96xf32> -> vector<2x96xf32>
    %471 = arith.addf %470, %41 : vector<2x96xf32>
    %472 = vector.extract_strided_slice %469 {offsets = [0, 0], sizes = [2, 32], strides = [1, 1]} : vector<2x96xf32> to vector<2x32xf32>
    %473 = vector.extract_strided_slice %471 {offsets = [0, 0], sizes = [2, 32], strides = [1, 1]} : vector<2x96xf32> to vector<2x32xf32>
    %474 = arith.addf %472, %473 : vector<2x32xf32>
    %475 = arith.negf %474 : vector<2x32xf32>
    %476 = math.exp %475 : vector<2x32xf32>
    %cst_116 = arith.constant 1.000000e+00 : f32
    %477 = vector.broadcast %cst_116 : f32 to vector<2x32xf32>
    %478 = arith.addf %477, %476 : vector<2x32xf32>
    %479 = arith.divf %477, %478 : vector<2x32xf32>
    %480 = vector.extract_strided_slice %469 {offsets = [0, 32], sizes = [2, 32], strides = [1, 1]} : vector<2x96xf32> to vector<2x32xf32>
    %481 = vector.extract_strided_slice %471 {offsets = [0, 32], sizes = [2, 32], strides = [1, 1]} : vector<2x96xf32> to vector<2x32xf32>
    %482 = arith.addf %480, %481 : vector<2x32xf32>
    %483 = arith.negf %482 : vector<2x32xf32>
    %484 = math.exp %483 : vector<2x32xf32>
    %cst_117 = arith.constant 1.000000e+00 : f32
    %485 = vector.broadcast %cst_117 : f32 to vector<2x32xf32>
    %486 = arith.addf %485, %484 : vector<2x32xf32>
    %487 = arith.divf %485, %486 : vector<2x32xf32>
    %488 = vector.extract_strided_slice %469 {offsets = [0, 64], sizes = [2, 32], strides = [1, 1]} : vector<2x96xf32> to vector<2x32xf32>
    %489 = vector.extract_strided_slice %471 {offsets = [0, 64], sizes = [2, 32], strides = [1, 1]} : vector<2x96xf32> to vector<2x32xf32>
    %490 = arith.mulf %479, %489 : vector<2x32xf32>
    %491 = arith.addf %488, %490 : vector<2x32xf32>
    %492 = math.tanh %491 : vector<2x32xf32>
    %cst_118 = arith.constant 1.000000e+00 : f32
    %493 = vector.broadcast %cst_118 : f32 to vector<2x32xf32>
    %494 = arith.subf %493, %487 : vector<2x32xf32>
    %495 = arith.mulf %494, %492 : vector<2x32xf32>
    %496 = arith.mulf %487, %438 : vector<2x32xf32>
    %497 = arith.addf %495, %496 : vector<2x32xf32>
    %cst_119 = arith.constant dense<0.000000e+00> : vector<2x96xf32>
    %498 = tpu.matmul %497, %29, %cst_119 {dimension_numbers = #tpu.dot_dimension_numbers<[1], [0], [0], [1], [0, 0, 1, 1], [], []>} : vector<2x32xf32>, vector<32x96xf32>, vector<2x96xf32> -> vector<2x96xf32>
    %499 = arith.addf %498, %37 : vector<2x96xf32>
    %cst_120 = arith.constant dense<0.000000e+00> : vector<2x96xf32>
    %500 = tpu.matmul %468, %33, %cst_120 {dimension_numbers = #tpu.dot_dimension_numbers<[1], [0], [0], [1], [0, 0, 1, 1], [], []>} : vector<2x32xf32>, vector<32x96xf32>, vector<2x96xf32> -> vector<2x96xf32>
    %501 = arith.addf %500, %45 : vector<2x96xf32>
    %502 = vector.extract_strided_slice %499 {offsets = [0, 0], sizes = [2, 32], strides = [1, 1]} : vector<2x96xf32> to vector<2x32xf32>
    %503 = vector.extract_strided_slice %501 {offsets = [0, 0], sizes = [2, 32], strides = [1, 1]} : vector<2x96xf32> to vector<2x32xf32>
    %504 = arith.addf %502, %503 : vector<2x32xf32>
    %505 = arith.negf %504 : vector<2x32xf32>
    %506 = math.exp %505 : vector<2x32xf32>
    %cst_121 = arith.constant 1.000000e+00 : f32
    %507 = vector.broadcast %cst_121 : f32 to vector<2x32xf32>
    %508 = arith.addf %507, %506 : vector<2x32xf32>
    %509 = arith.divf %507, %508 : vector<2x32xf32>
    %510 = vector.extract_strided_slice %499 {offsets = [0, 32], sizes = [2, 32], strides = [1, 1]} : vector<2x96xf32> to vector<2x32xf32>
    %511 = vector.extract_strided_slice %501 {offsets = [0, 32], sizes = [2, 32], strides = [1, 1]} : vector<2x96xf32> to vector<2x32xf32>
    %512 = arith.addf %510, %511 : vector<2x32xf32>
    %513 = arith.negf %512 : vector<2x32xf32>
    %514 = math.exp %513 : vector<2x32xf32>
    %cst_122 = arith.constant 1.000000e+00 : f32
    %515 = vector.broadcast %cst_122 : f32 to vector<2x32xf32>
    %516 = arith.addf %515, %514 : vector<2x32xf32>
    %517 = arith.divf %515, %516 : vector<2x32xf32>
    %518 = vector.extract_strided_slice %499 {offsets = [0, 64], sizes = [2, 32], strides = [1, 1]} : vector<2x96xf32> to vector<2x32xf32>
    %519 = vector.extract_strided_slice %501 {offsets = [0, 64], sizes = [2, 32], strides = [1, 1]} : vector<2x96xf32> to vector<2x32xf32>
    %520 = arith.mulf %509, %519 : vector<2x32xf32>
    %521 = arith.addf %518, %520 : vector<2x32xf32>
    %522 = math.tanh %521 : vector<2x32xf32>
    %cst_123 = arith.constant 1.000000e+00 : f32
    %523 = vector.broadcast %cst_123 : f32 to vector<2x32xf32>
    %524 = arith.subf %523, %517 : vector<2x32xf32>
    %525 = arith.mulf %524, %522 : vector<2x32xf32>
    %526 = arith.mulf %517, %468 : vector<2x32xf32>
    %527 = arith.addf %525, %526 : vector<2x32xf32>
    %c0_124 = arith.constant 0 : index
    %c0_125 = arith.constant 0 : index
    %c0_126 = arith.constant 0 : index
    %528 = vector.load %arg21[%c0_124, %c0_125, %c0_126] : memref<2x2x32xf32, #tpu.memory_space<vmem>>, vector<1x2x32xf32>
    %529 = vector.shape_cast %528 : vector<1x2x32xf32> to vector<2x32xf32>
    %530 = vector.shape_cast %497 : vector<2x32xf32> to vector<1x2x32xf32>
    tpu.vector_store %arg21[%c0_124, %c0_125, %c0_126], %530 {strides = array<i32>} : memref<2x2x32xf32, #tpu.memory_space<vmem>>, vector<1x2x32xf32>,
    %c1_127 = arith.constant 1 : index
    %c0_128 = arith.constant 0 : index
    %c0_129 = arith.constant 0 : index
    %531 = vector.load %arg21[%c1_127, %c0_128, %c0_129] : memref<2x2x32xf32, #tpu.memory_space<vmem>>, vector<1x2x32xf32>
    %532 = vector.shape_cast %531 : vector<1x2x32xf32> to vector<2x32xf32>
    %533 = vector.shape_cast %527 : vector<2x32xf32> to vector<1x2x32xf32>
    tpu.vector_store %arg21[%c1_127, %c0_128, %c0_129], %533 {strides = array<i32>} : memref<2x2x32xf32, #tpu.memory_space<vmem>>, vector<1x2x32xf32>,
    %534 = tpu.concatenate %350, %409, %468, %527 in 0 : vector<2x32xf32>, vector<2x32xf32>, vector<2x32xf32>, vector<2x32xf32> -> vector<8x32xf32>
    %cst_130 = arith.constant 0.000000e+00 : f32
    %535 = vector.broadcast %cst_130 : f32 to vector<8x32xf32>
    %536 = arith.maximumf %534, %535 : vector<8x32xf32>
    %c0_131 = arith.constant 0 : index
    %c0_132 = arith.constant 0 : index
    %537 = vector.load %arg14[%c0_131, %c0_132] : memref<32x32xf32, #tpu.memory_space<vmem>>, vector<32x32xf32>
    %cst_133 = arith.constant dense<0.000000e+00> : vector<8x32xf32>
    %538 = tpu.matmul %536, %537, %cst_133 {dimension_numbers = #tpu.dot_dimension_numbers<[1], [0], [0], [1], [0, 0, 1, 1], [], []>} : vector<8x32xf32>, vector<32x32xf32>, vector<8x32xf32> -> vector<8x32xf32>
    %c0_134 = arith.constant 0 : index
    %c0_135 = arith.constant 0 : index
    %539 = vector.load %arg15[%c0_134, %c0_135] : memref<1x32xf32, #tpu.memory_space<vmem>>, vector<1x32xf32>
    %540 = vector.broadcast %539 : vector<1x32xf32> to vector<8x32xf32>
    %541 = arith.addf %538, %540 : vector<8x32xf32>
    %cst_136 = arith.constant 0.000000e+00 : f32
    %542 = vector.broadcast %cst_136 : f32 to vector<8x32xf32>
    %543 = arith.maximumf %541, %542 : vector<8x32xf32>
    %c0_137 = arith.constant 0 : index
    %c0_138 = arith.constant 0 : index
    %544 = vector.load %arg16[%c0_137, %c0_138] : memref<32x32xf32, #tpu.memory_space<vmem>>, vector<32x32xf32>
    %cst_139 = arith.constant dense<0.000000e+00> : vector<8x32xf32>
    %545 = tpu.matmul %543, %544, %cst_139 {dimension_numbers = #tpu.dot_dimension_numbers<[1], [0], [0], [1], [0, 0, 1, 1], [], []>} : vector<8x32xf32>, vector<32x32xf32>, vector<8x32xf32> -> vector<8x32xf32>
    %c0_140 = arith.constant 0 : index
    %c0_141 = arith.constant 0 : index
    %546 = vector.load %arg17[%c0_140, %c0_141] : memref<1x32xf32, #tpu.memory_space<vmem>>, vector<1x32xf32>
    %547 = vector.broadcast %546 : vector<1x32xf32> to vector<8x32xf32>
    %548 = arith.addf %545, %547 : vector<8x32xf32>
    %cst_142 = arith.constant 0.000000e+00 : f32
    %549 = vector.broadcast %cst_142 : f32 to vector<8x32xf32>
    %550 = arith.maximumf %548, %549 : vector<8x32xf32>
    %c0_143 = arith.constant 0 : index
    %c0_144 = arith.constant 0 : index
    %551 = vector.load %arg18[%c0_143, %c0_144] : memref<32x2xf32, #tpu.memory_space<vmem>>, vector<32x2xf32>
    %cst_145 = arith.constant dense<0.000000e+00> : vector<8x2xf32>
    %552 = tpu.matmul %550, %551, %cst_145 {dimension_numbers = #tpu.dot_dimension_numbers<[1], [0], [0], [1], [0, 0, 1, 1], [], []>} : vector<8x32xf32>, vector<32x2xf32>, vector<8x2xf32> -> vector<8x2xf32>
    %c0_146 = arith.constant 0 : index
    %c0_147 = arith.constant 0 : index
    %553 = vector.load %arg19[%c0_146, %c0_147] : memref<1x2xf32, #tpu.memory_space<vmem>>, vector<1x2xf32>
    %554 = vector.broadcast %553 : vector<1x2xf32> to vector<8x2xf32>
    %555 = arith.addf %552, %554 : vector<8x2xf32>
    %c0_148 = arith.constant 0 : index
    %c0_149 = arith.constant 0 : index
    %556 = vector.load %arg20[%c0_148, %c0_149] : memref<8x2xf32, #tpu.memory_space<vmem>>, vector<8x2xf32>
    tpu.vector_store %arg20[%c0_148, %c0_149], %555 {strides = array<i32>} : memref<8x2xf32, #tpu.memory_space<vmem>>, vector<8x2xf32>,
    return
  }
}

</mosaic_0001>

<bundles_post_ra>
// kernel: tpu_custom_call.1
= control target key start
LH: loop header
LB: loop body
LE: loop exit
PB: predicated region body
PF: predicated region fallthrough
CT: control target
= control target key end

     0   :  { %s5159_s0 = inlined_call_operand.vmem [shape: f32[16,6], index: 0, kind: input, shape index: {}]   ;;  %s5160_s1 = inlined_call_operand.hbm [shape: f32[2,2,32], index: 1, kind: input, shape index: {}]   ;;  %s5161_s2 = inlined_call_operand.hbm [shape: f32[6,32], index: 2, kind: input, shape index: {}]   ;;  %s5162_s3 = inlined_call_operand.vmem [shape: f32[1,32], index: 3, kind: input, shape index: {}]   ;;  %s5163_s4 = inlined_call_operand.hbm [shape: f32[32,32], index: 4, kind: input, shape index: {}]   ;;  %s5164_s5 = inlined_call_operand.hbm [shape: f32[1,32], index: 5, kind: input, shape index: {}]   ;;  %s5165_s6 = inlined_call_operand.hbm [shape: f32[32,32], index: 6, kind: input, shape index: {}]   ;;  %s5166_s7 = inlined_call_operand.hbm [shape: f32[1,32], index: 7, kind: input, shape index: {}]   ;;  %s5167_s8 = inlined_call_operand.hbm [shape: f32[32,32], index: 8, kind: input, shape index: {}]   ;;  %s5168_s9 = inlined_call_operand.hbm [shape: f32[1,32], index: 9, kind: input, shape index: {}]   ;;  %s5169_s10 = inlined_call_operand.vmem [shape: f32[2,32,96], index: 10, kind: input, shape index: {}]   ;;  %s5170_s11 = inlined_call_operand.hbm [shape: f32[2,32,96], index: 11, kind: input, shape index: {}]   ;;  %s5171_s12 = inlined_call_operand.vmem [shape: f32[2,1,96], index: 12, kind: input, shape index: {}]   ;;  %s5172_s13 = inlined_call_operand.vmem [shape: f32[2,1,96], index: 13, kind: input, shape index: {}]   ;;  %s5173_s14 = inlined_call_operand.vmem [shape: f32[32,32], index: 14, kind: input, shape index: {}]   ;;  %s5174_s15 = inlined_call_operand.vmem [shape: f32[1,32], index: 15, kind: input, shape index: {}]   ;;  %s5175_s16 = inlined_call_operand.hbm [shape: f32[32,32], index: 16, kind: input, shape index: {}]   ;;  %s5176_s17 = inlined_call_operand.vmem [shape: f32[1,32], index: 17, kind: input, shape index: {}]   ;;  %s5177_s18 = inlined_call_operand.vmem [shape: f32[32,2], index: 18, kind: input, shape index: {}]   ;;  %s5178_s19 = inlined_call_operand.vmem [shape: f32[1,2], index: 19, kind: input, shape index: {}]   ;;  %s5179_s20 = inlined_call_operand.vmem [shape: f32[8,2], index: 20, kind: output, shape index: {0}]   ;;  %s5180_s21 = inlined_call_operand.hbm [shape: f32[2,2,32], index: 21, kind: output, shape index: {1}]  }
   0x1   :  { %5189 = sst [smem:[#allocation27_spill]] %s5159_s0 }
   0x2   :  { %5190 = sst [smem:[#allocation28_spill]] %s5160_s1 }
   0x3   :  { %5191 = sst [smem:[#allocation29_spill]] %s5161_s2 }
   0x4   :  { %5192 = sst [smem:[#allocation30_spill]] %s5162_s3 }
   0x5   :  { %5193 = sst [smem:[#allocation31_spill]] %s5163_s4 }
   0x6   :  { %5194 = sst [smem:[#allocation32_spill]] %s5164_s5 }
   0x7   :  { %27 = vsyncpa [#allocation3], 0 }
   0x8   :  { %28 = vsyncpa [#allocation6], 0 }
   0x9   :  { %29 = vsyncpa [#allocation9], 0 }
   0xa   :  { %30 = vsyncpa [#allocation12], 0 }
   0xb   :  { %31 = vsyncpa [#allocation15], 0 }
   0xc   :  { %32 = vsyncpa [#allocation18], 0 }
   0xd   :  { %33 = vsyncpa [#allocation4], 0  ;;  %s4381_s2 = smov [#allocation5]   ;;  %s4382_s26 = smov [#allocation8]  }
   0xe   :  { %s54_s25 = sshll.u32 %s4381_s2, 4  ;;  %s78_s27 = sshll.u32 %s4382_s26, 4  ;;  %s55_s25 = int_to_ptr.vmem [resolvable:$true] %s54_s25  ;;  %s79_s27 = int_to_ptr.vmem [resolvable:$true] %s78_s27 }
   0xf   :  { %s5195_s29 = sld [smem:[#allocation29_spill]] }
  0x15   :  { %s4125_s0 = scalar_lea.hbm %s5195_s29, 128 }
  0x16   :  { %p4126_p0 = scmp.ne.s32.totalorder %s5195_s29, %s4125_s0  ;;  %p4129_p1 = scmp.lt.u32.totalorder %s4125_s0, %s5195_s29 }
  0x18   :  { %p4131_p2 = pnand %p4129_p1, %p4126_p0 }
  0x1a   :  { %4134 = shalt.err (!%p4131_p2)
}
  0x1b   :  { %s4135_s23 = scalar_lea.vmem %s55_s25, 128  ;;  %p4140_p4 = scmp.lt.s32.totalorder %s55_s25, %s55_s25 }
  0x1c   :  { %p4136_p3 = scmp.ne.s32.totalorder %s55_s25, %s4135_s23  ;;  %p4141_p5 = scmp.lt.s32.totalorder %s4135_s23, %s4135_s23 }
  0x1e   :  { %p4142_p6 = por %p4141_p5, %p4140_p4 }
  0x20   :  { %p4143_p7 = pnand %p4142_p6, %p4136_p3 }
  0x22   :  { %4146 = shalt.err (!%p4143_p7)
}
  0x23   :  { %57 = dma.hbm_to_vmem [thread:$0]  %s5195_s29, 128, %s55_s25, [#allocation6]  }
  0x24   :  { %s5196_s3 = sld [smem:[#allocation32_spill]] }
  0x2a   :  { %s4147_s28 = scalar_lea.hbm %s5196_s3, 16 }
  0x2b   :  { %p4148_p8 = scmp.ne.s32.totalorder %s5196_s3, %s4147_s28  ;;  %p4151_p9 = scmp.lt.u32.totalorder %s4147_s28, %s5196_s3 }
  0x2d   :  { %p4153_p10 = pnand %p4151_p9, %p4148_p8 }
  0x2f   :  { %4156 = shalt.err (!%p4153_p10)
}
  0x30   :  { %s4157_s22 = scalar_lea.vmem %s79_s27, 16  ;;  %s4161_s23 = scalar_lea.vmem %s79_s27, 32 }
  0x31   :  { %p4158_p11 = scmp.ne.s32.totalorder %s79_s27, %s4157_s22  ;;  %p4162_p12 = scmp.lt.s32.totalorder %s79_s27, %s79_s27 }
  0x32   :  { %p4163_p13 = scmp.lt.s32.totalorder %s4161_s23, %s4157_s22 }
  0x34   :  { %p4164_p0 = por %p4163_p13, %p4162_p12 }
  0x36   :  { %p4165_p1 = pnand %p4164_p0, %p4158_p11 }
  0x38   :  { %4168 = shalt.err (!%p4165_p1)
}
  0x39   :  { %81 = dma.hbm_to_vmem [thread:$0]  %s5196_s3, 16, %s79_s27, [#allocation9]  }
  0x3a   :  { %s4383_s1 = smov [#allocation11]   ;;  %s4384_s2 = smov [#allocation14]  }
  0x3b   :  { %s100_s24 = sshll.u32 %s4383_s1, 4  ;;  %s122_s26 = sshll.u32 %s4384_s2, 4  ;;  %s101_s24 = int_to_ptr.vmem [resolvable:$true] %s100_s24  ;;  %s123_s26 = int_to_ptr.vmem [resolvable:$true] %s122_s26 }
  0x3c   :  { %s4169_s30 = scalar_lea.hbm %s5166_s7, 16 }
  0x3d   :  { %p4170_p2 = scmp.ne.s32.totalorder %s5166_s7, %s4169_s30  ;;  %p4173_p3 = scmp.lt.u32.totalorder %s4169_s30, %s5166_s7 }
  0x3f   :  { %p4175_p4 = pnand %p4173_p3, %p4170_p2 }
  0x41   :  { %4178 = shalt.err (!%p4175_p4)
}
  0x42   :  { %s4179_s27 = scalar_lea.vmem %s101_s24, 16  ;;  %s4183_s3 = scalar_lea.vmem %s101_s24, 32 }
  0x43   :  { %p4180_p5 = scmp.ne.s32.totalorder %s101_s24, %s4179_s27  ;;  %p4184_p6 = scmp.lt.s32.totalorder %s101_s24, %s101_s24 }
  0x44   :  { %p4185_p7 = scmp.lt.s32.totalorder %s4183_s3, %s4179_s27 }
  0x46   :  { %p4186_p8 = por %p4185_p7, %p4184_p6 }
  0x48   :  { %p4187_p9 = pnand %p4186_p8, %p4180_p5 }
  0x4a   :  { %4190 = shalt.err (!%p4187_p9)
}
  0x4b   :  { %103 = dma.hbm_to_vmem [thread:$0]  %s5166_s7, 16, %s101_s24, [#allocation12]  }
  0x4c   :  { %s4191_s28 = scalar_lea.hbm %s5168_s9, 16 }
  0x4d   :  { %p4192_p10 = scmp.ne.s32.totalorder %s5168_s9, %s4191_s28  ;;  %p4195_p11 = scmp.lt.u32.totalorder %s4191_s28, %s5168_s9 }
  0x4f   :  { %p4197_p12 = pnand %p4195_p11, %p4192_p10 }
  0x51   :  { %4200 = shalt.err (!%p4197_p12)
}
  0x52   :  { %s4201_s22 = scalar_lea.vmem %s123_s26, 16  ;;  %s4205_s23 = scalar_lea.vmem %s123_s26, 32 }
  0x53   :  { %p4202_p13 = scmp.ne.s32.totalorder %s123_s26, %s4201_s22  ;;  %p4206_p0 = scmp.lt.s32.totalorder %s123_s26, %s123_s26 }
  0x54   :  { %p4207_p1 = scmp.lt.s32.totalorder %s4205_s23, %s4201_s22 }
  0x56   :  { %p4208_p2 = por %p4207_p1, %p4206_p0 }
  0x58   :  { %p4209_p3 = pnand %p4208_p2, %p4202_p13 }
  0x5a   :  { %4212 = shalt.err (!%p4209_p3)
}
  0x5b   :  { %125 = dma.hbm_to_vmem [thread:$0]  %s5168_s9, 16, %s123_s26, [#allocation15]  }
  0x5c   :  { %s4385_s27 = smov [#allocation2]   ;;  %s5197_s1 = sld [smem:[#allocation28_spill]] }
  0x5d   :  { %s41_s3 = sshll.u32 %s4385_s27, 4  ;;  %s42_s3 = int_to_ptr.vmem [resolvable:$true] %s41_s3 }
  0x62   :  { %s4213_s2 = scalar_lea.hbm %s5197_s1, 64 }
  0x63   :  { %p4214_p4 = scmp.ne.s32.totalorder %s5197_s1, %s4213_s2  ;;  %p4217_p5 = scmp.lt.u32.totalorder %s4213_s2, %s5197_s1 }
  0x65   :  { %p4219_p6 = pnand %p4217_p5, %p4214_p4 }
  0x67   :  { %4222 = shalt.err (!%p4219_p6)
}
  0x68   :  { %s4223_s5 = scalar_lea.vmem %s42_s3, 64  ;;  %p4228_p8 = scmp.lt.s32.totalorder %s42_s3, %s42_s3 }
  0x69   :  { %p4224_p7 = scmp.ne.s32.totalorder %s42_s3, %s4223_s5  ;;  %p4229_p9 = scmp.lt.s32.totalorder %s4223_s5, %s4223_s5 }
  0x6b   :  { %p4230_p10 = por %p4229_p9, %p4228_p8 }
  0x6d   :  { %p4231_p11 = pnand %p4230_p10, %p4224_p7 }
  0x6f   :  { %4234 = shalt.err (!%p4231_p11)
}
  0x70   :  { %s5187_s9 = smov 32   ;;  %s5186_s26 = smov 2  }
  0x71   :  { %47 = dma.hbm_to_vmem [thread:$0]  %s5197_s1, 64, %s42_s3, [#allocation3], %s5187_s9, %s5187_s9, %s5186_s26  }
  0x72   :  { %s4388_s7 = smov [#allocation7]   ;;  %s5198_s29 = sld [smem:[#allocation31_spill]] }
  0x73   :  { %s65_s24 = sshll.u32 %s4388_s7, 4  ;;  %s66_s24 = int_to_ptr.vmem [resolvable:$true] %s65_s24 }
  0x78   :  { %s4235_s2 = scalar_lea.hbm %s5198_s29, 512 }
  0x79   :  { %p4236_p12 = scmp.ne.s32.totalorder %s5198_s29, %s4235_s2  ;;  %p4239_p13 = scmp.lt.u32.totalorder %s4235_s2, %s5198_s29 }
  0x7b   :  { %p4241_p0 = pnand %p4239_p13, %p4236_p12 }
  0x7d   :  { %4244 = shalt.err (!%p4241_p0)
}
  0x7e   :  { %s4245_s5 = scalar_lea.vmem %s66_s24, 512  ;;  %p4250_p2 = scmp.lt.s32.totalorder %s66_s24, %s66_s24 }
  0x7f   :  { %p4246_p1 = scmp.ne.s32.totalorder %s66_s24, %s4245_s5  ;;  %p4251_p3 = scmp.lt.s32.totalorder %s4245_s5, %s4245_s5 }
  0x81   :  { %p4252_p4 = por %p4251_p3, %p4250_p2 }
  0x83   :  { %p4253_p5 = pnand %p4252_p4, %p4246_p1 }
  0x85   :  { %4256 = shalt.err (!%p4253_p5)
}
  0x86   :  { %s4389_s3 = smov 128   ;;  %s4390_s1 = smov 8  }
  0x87   :  { %71 = dma.hbm_to_vmem [thread:$0]  %s5198_s29, 512, %s66_s24, [#allocation6], %s4389_s3, %s4389_s3, %s4390_s1  }
  0x88   :  { %s4391_s7 = smov [#allocation10]   ;;  %s4392_s25 = smov [#allocation13]  }
  0x89   :  { %s87_s27 = sshll.u32 %s4391_s7, 4  ;;  %s109_s2 = sshll.u32 %s4392_s25, 4  ;;  %s88_s27 = int_to_ptr.vmem [resolvable:$true] %s87_s27  ;;  %s4589_s2 = int_to_ptr.vmem [resolvable:$true] %s109_s2 }
  0x8a   :  { %s4257_s30 = scalar_lea.hbm %s5165_s6, 512 }
  0x8b   :  { %p4258_p6 = scmp.ne.s32.totalorder %s5165_s6, %s4257_s30  ;;  %p4261_p7 = scmp.lt.u32.totalorder %s4257_s30, %s5165_s6 }
  0x8d   :  { %p4263_p8 = pnand %p4261_p7, %p4258_p6 }
  0x8f   :  { %4266 = shalt.err (!%p4263_p8)
}
  0x90   :  { %s4267_s24 = scalar_lea.vmem %s88_s27, 512  ;;  %p4272_p10 = scmp.lt.s32.totalorder %s88_s27, %s88_s27 }
  0x91   :  { %p4268_p9 = scmp.ne.s32.totalorder %s88_s27, %s4267_s24  ;;  %p4273_p11 = scmp.lt.s32.totalorder %s4267_s24, %s4267_s24 }
  0x93   :  { %p4274_p12 = por %p4273_p11, %p4272_p10 }
  0x95   :  { %p4275_p13 = pnand %p4274_p12, %p4268_p9 }
  0x97   :  { %4278 = shalt.err (!%p4275_p13)
}
  0x98   :  { %93 = dma.hbm_to_vmem [thread:$0]  %s5165_s6, 512, %s88_s27, [#allocation9], %s4389_s3, %s4389_s3, %s4390_s1  }
  0x99   :  { %s4279_s9 = scalar_lea.hbm %s5167_s8, 512 }
  0x9a   :  { %p4280_p0 = scmp.ne.s32.totalorder %s5167_s8, %s4279_s9  ;;  %p4283_p1 = scmp.lt.u32.totalorder %s4279_s9, %s5167_s8 }
  0x9c   :  { %p4285_p2 = pnand %p4283_p1, %p4280_p0 }
  0x9e   :  { %4288 = shalt.err (!%p4285_p2)
}
  0x9f   :  { %s4289_s30 = scalar_lea.vmem %s4589_s2, 512  ;;  %p4294_p4 = scmp.lt.s32.totalorder %s4589_s2, %s4589_s2 }
  0xa0   :  { %p4290_p3 = scmp.ne.s32.totalorder %s4589_s2, %s4289_s30  ;;  %p4295_p5 = scmp.lt.s32.totalorder %s4289_s30, %s4289_s30 }
  0xa2   :  { %p4296_p6 = por %p4295_p5, %p4294_p4 }
  0xa4   :  { %p4297_p7 = pnand %p4296_p6, %p4290_p3 }
  0xa6   :  { %4300 = shalt.err (!%p4297_p7)
}
  0xa7   :  { %115 = dma.hbm_to_vmem [thread:$0]  %s5167_s8, 512, %s4589_s2, [#allocation12], %s4389_s3, %s4389_s3, %s4390_s1  }
  0xa8   :  { %s4393_s0 = smov [#allocation16]   ;;  %s4394_s24 = smov [#allocation17]  }
  0xa9   :  { %s133_s5 = sshll.u32 %s4393_s0, 4  ;;  %s153_s29 = sshll.u32 %s4394_s24, 4  ;;  %s134_s5 = int_to_ptr.vmem [resolvable:$true] %s133_s5  ;;  %s4626_s29 = int_to_ptr.vmem [resolvable:$true] %s153_s29 }
  0xaa   :  { %s4301_s7 = scalar_lea.hbm %s5170_s11, 1024 }
  0xab   :  { %p4302_p8 = scmp.ne.s32.totalorder %s5170_s11, %s4301_s7  ;;  %p4305_p9 = scmp.lt.u32.totalorder %s4301_s7, %s5170_s11 }
  0xad   :  { %p4307_p10 = pnand %p4305_p9, %p4302_p8 }
  0xaf   :  { %4310 = shalt.err (!%p4307_p10)
}
  0xb0   :  { %s4311_s8 = scalar_lea.vmem %s134_s5, 1024  ;;  %p4316_p12 = scmp.lt.s32.totalorder %s134_s5, %s134_s5 }
  0xb1   :  { %p4312_p11 = scmp.ne.s32.totalorder %s134_s5, %s4311_s8  ;;  %p4317_p13 = scmp.lt.s32.totalorder %s4311_s8, %s4311_s8 }
  0xb3   :  { %p4318_p0 = por %p4317_p13, %p4316_p12 }
  0xb5   :  { %p4319_p1 = pnand %p4318_p0, %p4312_p11 }
  0xb7   :  { %4322 = shalt.err (!%p4319_p1)
}
  0xb8   :  { %139 = dma.hbm_to_vmem [thread:$0]  %s5170_s11, 1024, %s134_s5, [#allocation15], %s4389_s3, %s4389_s3, %s4390_s1  }
  0xb9   :  { %s4323_s27 = scalar_lea.hbm %s5175_s16, 512 }
  0xba   :  { %p4324_p2 = scmp.ne.s32.totalorder %s5175_s16, %s4323_s27  ;;  %p4327_p3 = scmp.lt.u32.totalorder %s4323_s27, %s5175_s16 }
  0xbc   :  { %p4329_p4 = pnand %p4327_p3, %p4324_p2 }
  0xbe   :  { %4332 = shalt.err (!%p4329_p4)
}
  0xbf   :  { %s4333_s7 = scalar_lea.vmem %s4626_s29, 512  ;;  %p4338_p6 = scmp.lt.s32.totalorder %s4626_s29, %s4626_s29 }
  0xc0   :  { %p4334_p5 = scmp.ne.s32.totalorder %s4626_s29, %s4333_s7  ;;  %p4339_p7 = scmp.lt.s32.totalorder %s4333_s7, %s4333_s7 }
  0xc2   :  { %p4340_p8 = por %p4339_p7, %p4338_p6 }
  0xc4   :  { %p4341_p9 = pnand %p4340_p8, %p4334_p5 }
  0xc6   :  { %4344 = shalt.err (!%p4341_p9)
}
  0xc7   :  { %159 = dma.hbm_to_vmem [thread:$0]  %s5175_s16, 512, %s4626_s29, [#allocation18], %s4389_s3, %s4389_s3, %s4390_s1  }
  0xc8   :  { %4367 = dma.done.wait [#allocation3], 64  }
  0xc9   :  { %4368 = vsyncadd [#allocation3], 4294967232 }
  0xca   :  { %4369 = dma.done.wait [#allocation6], 640  }
  0xcb   :  { %4370 = vsyncadd [#allocation6], 4294966656 }
  0xcc   :  { %4371 = dma.done.wait [#allocation9], 528  }
  0xcd   :  { %4372 = vsyncadd [#allocation9], 4294966768 }
  0xce   :  { %4373 = dma.done.wait [#allocation12], 528  }
  0xcf   :  { %4374 = vsyncadd [#allocation12], 4294966768 }
  0xd0   :  { %4375 = dma.done.wait [#allocation15], 1040  }
  0xd1   :  { %4376 = vsyncadd [#allocation15], 4294966256 }
  0xd2   :  { %4377 = dma.done.wait [#allocation18], 512  }
  0xd3   :  { %4378 = vsyncadd [#allocation18], 4294966784  ;;  %vm213_vm0 = vcmask 1045504   ;;  %vm206_vm1 = vcmask 48128   ;;  %v198_v0 = vld [vmem:[#allocation5] sm:$0x3f] }
  0xd4   :  { %s5199_s25 = sld [smem:[#allocation27_spill]]  ;;  %3462 = vmatprep.subr.msk.mxu0 %vm213_vm0, %v198_v0  ;;  %v294_v3 = vld [vmem:[#allocation7] sm:$0xff]  ;;  %v295_v4 = vld [vmem:[#allocation7 + $0x8] sm:$0xff]  ;;  %v296_v5 = vld [vmem:[#allocation7 + $0x10] sm:$0xff]  ;;  %s5200_s28 = sld [smem:[#allocation30_spill]]  ;;  %vm305_vm2 = vcmask 261120  }
  0xd5   :  { %3463 = vmatpush3.msk.msra.mxu0 %vm213_vm0, %v198_v0  ;;  %v3808_v6 = vpack.c.bf16 %v295_v4, %v294_v3  ;;  %v297_v7 = vld [vmem:[#allocation7 + $0x18] sm:$0xff]  ;;  %v389_v9 = vld [vmem:[#allocation10] sm:$0xff]  ;;  %v390_v10 = vld [vmem:[#allocation10 + $0x8] sm:$0xff]  ;;  %v4395_v35 = vmov 0.0|0.0   ;;  %vm4396_vm3 = vmmov 0   ;;  %v4397_v52 = vmov 0.0  }
  0xd6   :  { %v3812_v8 = vpack.c.bf16 %v297_v7, %v296_v5  ;;  %v3816_v11 = vpack.c.bf16 %v390_v10, %v389_v9  ;;  %v391_v19 = vld [vmem:[#allocation10 + $0x10] sm:$0xff]  ;;  %v392_v20 = vld [vmem:[#allocation10 + $0x18] sm:$0xff]  ;;  %v483_v22 = vld [vmem:[#allocation13] sm:$0xff]  ;;  %s4398_s7 = smov 64   ;;  %s4399_s8 = smov 96   ;;  %vm2924_vm4 = vcmask 261126  }
  0xd7   :  { %3809 = vmatprep.subr.bf16.mxu1 %v3808_v6  ;;  %v3820_v21 = vpack.c.bf16 %v392_v20, %v391_v19  ;;  %v484_v23 = vld [vmem:[#allocation13 + $0x8] sm:$0xff]  ;;  %v3233_v25 = vld [vmem:[#allocation8] ss:$0 sm:$0xff]  ;;  %v485_v32 = vld [vmem:[#allocation13 + $0x10] sm:$0xff]  ;;  %vm2939_vm5 = vcmask 1041408   ;;  %vm2941_vm6 = vcmask 1043456  }
  0xd8   :  { %3811 = vmatpush3.bf16.msra.mxu1 %v3808_v6  ;;  %3817 = vmatprep.subr.bf16.mxu0 %v3816_v11  ;;  %v3824_v24 = vpack.c.bf16 %v484_v23, %v483_v22  ;;  %v486_v33 = vld [vmem:[#allocation13 + $0x18] sm:$0xff]  ;;  %v575_v36 = vld [vmem:[%s5169_s10] sm:$0xff]  ;;  %v584_v43 = vld [vmem:[#allocation16] sm:$0xff]  ;;  %vm2931_vm7 = vcmask 254976  }
  0xd9   :  { %3813 = vmatprep.subr.bf16.mxu1 %v3812_v8  ;;  %v3828_v34 = vpack.c.bf16 %v486_v33, %v485_v32  ;;  %v576_v37 = vld [vmem:[%s5169_s10 + $0x8] sm:$0xff]  ;;  %v585_v44 = vld [vmem:[#allocation16 + $0x8] sm:$0xff]  ;;  %v577_v54 = vld [vmem:[%s5169_s10 + $0x10] sm:$0xff] }
  0xda   :  { %v196_v1 = vld [vmem:[%s5199_s25] sm:$0xff]  ;;  %v197_v2 = vld [vmem:[%s5199_s25 + $0x8] sm:$0xff]  ;;  %v3832_v38 = vpack.c.bf16 %v576_v37, %v575_v36  ;;  %v4685_v47 = vpack.c.bf16 %v585_v44, %v584_v43  ;;  %v578_v55 = vld [vmem:[%s5169_s10 + $0x18] sm:$0xff] }
  0xdb   :  { %3464 = vmatprep.mubr.msk.f32.mxu0 %vm206_vm1, %v196_v1  ;;  %v3229_v12 = vld [vmem:[%s5200_s28] ss:$0 sm:$0xff]  ;;  %v3236_v39 = vld [vmem:[#allocation11] ss:$0 sm:$0xff]  ;;  %v586_v49 = vld [vmem:[#allocation16 + $0x10] sm:$0xff]  ;;  %v3836_v56 = vpack.c.bf16 %v578_v55, %v577_v54 }
  0xdc   :  { %3465 = vmatmul.mubr.msk.f32.vlgmr.msra.gmra.mrb[0].mxu0 %vm206_vm1, %v197_v2  ;;  %3815 = vmatpush3.bf16.msra.mxu1 %v3812_v8  ;;  %v587_v50 = vld [vmem:[#allocation16 + $0x18] sm:$0xff]  ;;  %v4696_v53 = vld [vmem:[#allocation2] sm:$0x3] }
  0xdd   :  { %3819 = vmatpush3.bf16.msra.mxu0 %v3816_v11  ;;  %3825 = vmatprep.subr.bf16.mxu1 %v3824_v24  ;;  %v4690_v51 = vpack.c.bf16 %v587_v50, %v586_v49  ;;  %v3239_v57 = vld [vmem:[#allocation14] ss:$0 sm:$0xff]  ;;  %v4715_v62 = vld [vmem:[%s5172_s13] ss:$0 sm:$0xff]  ;;  %v3243_v22 = vld [vmem:[%s5169_s10 + $0x28] sm:$0xff] }
  0xde   :  { %3821 = vmatprep.subr.bf16.mxu0 %v3820_v21  ;;  %v3251_v2 = vld [vmem:[%s5171_s12] ss:$0 sm:$0xff]  ;;  %v592_v20 = vld [vmem:[#allocation16 + $0x38] sm:$0xff]  ;;  %v4779_v37 = vld [vmem:[%s5172_s13 + $0x1] ss:$0 sm:$0xff] }
  0xdf   :  { %v3244_v23 = vld [vmem:[%s5169_s10 + $0x30] sm:$0xff] }
  0xe1   :  { %3823 = vmatpush3.bf16.msra.mxu0 %v3820_v21  ;;  %v3242_v21 = vld [vmem:[%s5169_s10 + $0x20] sm:$0xff] }
  0xe2   :  { %3833 = vmatprep.subr.bf16.mxu0 %v3832_v38 }
 0x1af   :  { %v3466_v13 = vpop.f32.mrb[0].mxu0 }
 0x1b0   :  { %v289_v14 = vadd.f32 %v3466_v13, %v3229_v12  ;;  %v283_v15 = vpop.f32.mrb[1].mxu0 }
 0x1b1   :  { %v284_v16 = vadd.f32 %v3229_v12, %v283_v15 }
 0x1b3   :  { %4022 = vtanh.f32 %v284_v16  ;;  %v589_v16 = vld [vmem:[#allocation16 + $0x20] sm:$0xff] }
 0x1b4   :  { %4024 = vtanh.f32 %v289_v14 }
 0x1bd   :  { %v4023_v17 = vpop.eup %4022 }
 0x1be   :  { %v4025_v18 = vpop.eup %4024  ;;  %3475 = vmatprep.mubr.msk.f32.mxu1 %vm305_vm2, %v4023_v17  ;;  %v590_v17 = vld [vmem:[#allocation16 + $0x28] sm:$0xff] }
 0x1bf   :  { %3476 = vmatmul.mubr.msk.f32.vlgmr.msra.gmra.mrb[0].mxu1 %vm305_vm2, %v4025_v18  ;;  %v591_v18 = vld [vmem:[#allocation16 + $0x30] sm:$0xff]  ;;  %v4731_v19 = vpack.c.bf16 %v590_v17, %v589_v16 }
 0x1c0   :  { %3827 = vmatpush3.bf16.msra.mxu1 %v3824_v24  ;;  %v3245_v24 = vld [vmem:[%s5169_s10 + $0x38] sm:$0xff]  ;;  %s5201_s10 = smov 32  }
 0x1c1   :  { %3829 = vmatprep.subr.bf16.mxu1 %v3828_v34 }
 0x1c4   :  { %3831 = vmatpush3.bf16.msra.mxu1 %v3828_v34 }
 0x1c5   :  { %3840 = vmatprep.subr.bf16.mxu1 %v4395_v35 }
 0x292   :  { %v3477_v26 = vpop.f32.mrb[0].mxu1 }
 0x293   :  { %v384_v27 = vadd.f32 %v3477_v26, %v3233_v25  ;;  %v378_v28 = vpop.f32.mrb[1].mxu1  ;;  %v4748_v26 = vpack.c.bf16 %v3243_v22, %v3242_v21 }
 0x294   :  { %v379_v29 = vadd.f32 %v3233_v25, %v378_v28  ;;  %v4746_v25 = vpack.c.bf16 %v592_v20, %v591_v18  ;;  %v4753_v28 = vpack.c.bf16 %v3245_v24, %v3244_v23 }
 0x295   :  { %v388_v31 = vmax.f32 %v384_v27, 0.0 }
 0x296   :  { %v387_v30 = vmax.f32 %v379_v29, 0.0  ;;  %v4757_v29 = vld [vmem:[#allocation2 + $0x2] sm:$0x3] }
 0x298   :  { %3486 = vmatprep.mubr.msk.f32.mxu0 %vm305_vm2, %v387_v30 }
 0x299   :  { %3487 = vmatmul.mubr.msk.f32.vlgmr.msra.gmra.mrb[2].mxu0 %vm305_vm2, %v388_v31 }
 0x29a   :  { %3835 = vmatpush3.bf16.msra.mxu0 %v3832_v38 }
 0x29b   :  { %3837 = vmatprep.subr.bf16.mxu0 %v3836_v56 }
 0x29e   :  { %3839 = vmatpush3.bf16.msra.mxu0 %v3836_v56 }
 0x29f   :  { %3846 = vmatprep.subr.bf16.mxu0 %v4395_v35 }
 0x36c   :  { %v3488_v40 = vpop.f32.mrb[2].mxu0 }
 0x36d   :  { %v478_v41 = vadd.f32 %v3488_v40, %v3236_v39  ;;  %v472_v42 = vpop.f32.mrb[3].mxu0 }
 0x36e   :  { %v473_v45 = vadd.f32 %v3236_v39, %v472_v42  ;;  %v4800_v42 = vld [vmem:[%s5171_s12 + $0x1] ss:$0 sm:$0xff] }
 0x36f   :  { %v482_v48 = vmax.f32 %v478_v41, 0.0 }
 0x370   :  { %v481_v46 = vmax.f32 %v473_v45, 0.0 }
 0x372   :  { %3497 = vmatprep.mubr.msk.f32.mxu1 %vm305_vm2, %v481_v46 }
 0x373   :  { %3498 = vmatmul.mubr.msk.f32.vlgmr.msra.gmra.mrb[2].mxu1 %vm305_vm2, %v482_v48 }
 0x374   :  { %3842 = vmatpush3.bf16.msra.mxu1 %v4685_v47  ;;  %3519 = vmatprep.mubr.msk.f32.mxu1 %vm4396_vm3, %v4397_v52 }
 0x375   :  { %3843 = vmatprep.subr.bf16.mxu1 %v4395_v35 }
 0x378   :  { %3845 = vmatpush3.bf16.msra.mxu1 %v4690_v51 }
 0x379   :  { %3852 = vmatprep.subr.bf16.mxu1 %v4395_v35 }
 0x37b   :  { %3520 = vmatmul.mubr.msk.f32.vlgmr.msra.gmra.mrb[4].mxu1 %vm305_vm2, %v4696_v53 }
 0x37c   :  { %3541 = vmatprep.mubr.msk.f32.mxu1 %vm4396_vm3, %v4397_v52  ;;  %3854 = vmatpush3.bf16.msra.mxu1 %v4731_v19 }
 0x37d   :  { %3855 = vmatprep.subr.bf16.mxu1 %v4395_v35 }
 0x380   :  { %3857 = vmatpush3.bf16.msra.mxu1 %v4746_v25 }
 0x381   :  { %3864 = vmatprep.subr.bf16.mxu1 %v4395_v35 }
 0x383   :  { %3542 = vmatmul.mubr.msk.f32.vlgmr.msra.gmra.mrb[6].mxu1 %vm305_vm2, %v4757_v29 }
 0x384   :  { %3866 = vmatpush3.bf16.msra.mxu1 %v4748_v26  ;;  %3563 = vmatprep.mubr.msk.f32.mxu1 %vm4396_vm3, %v4397_v52 }
 0x385   :  { %3867 = vmatprep.subr.bf16.mxu1 %v4395_v35 }
 0x388   :  { %3869 = vmatpush3.bf16.msra.mxu1 %v4753_v28 }
 0x389   :  { %3876 = vmatprep.subr.bf16.mxu1 %v4395_v35 }
 0x446   :  { %v3499_v58 = vpop.f32.mrb[2].mxu1 }
 0x447   :  { %v566_v59 = vpop.f32.mrb[3].mxu1  ;;  %v572_v61 = vadd.f32 %v3499_v58, %v3239_v57 }
 0x448   :  { %v567_v60 = vadd.f32 %v3239_v57, %v566_v59 }
 0x44a   :  { %3508 = vmatprep.mubr.msk.f32.mxu0 %vm305_vm2, %v567_v60 }
 0x44b   :  { %3509 = vmatmul.mubr.msk.f32.vlgmr.msra.gmra.mrb[4].mxu0 %vm305_vm2, %v572_v61 }
 0x44c   :  { %3530 = vmatprep.mubr.msk.f32.mxu0 %vm4396_vm3, %v4397_v52  ;;  %3848 = vmatpush3.bf16.msra.mxu0 %v4748_v26 }
 0x44d   :  { %3849 = vmatprep.subr.bf16.mxu0 %v4395_v35 }
 0x44e   :  { %v776_v63 = vpop.f32.mrb[4].mxu1 }
 0x44f   :  { %v777_v0 = vadd.f32 %v4715_v62, %v776_v63  ;;  %v3521_v1 = vpop.f32.mrb[5].mxu1 }
 0x450   :  { %3851 = vmatpush3.bf16.msra.mxu0 %v4753_v28 }
 0x451   :  { %788 = vrot.lane.b32.xlu0 %v777_v0, %s4398_s7  ;;  %3858 = vmatprep.subr.bf16.mxu0 %v4395_v35 }
 0x456   :  { %v953_v38 = vpop.f32.mrb[6].mxu1 }
 0x457   :  { %v954_v39 = vadd.f32 %v4779_v37, %v953_v38  ;;  %v3543_v40 = vpop.f32.mrb[7].mxu1 }
 0x4c3   :  { %v789_v11 = vpop.permute.xlu0 %788 }
 0x51e   :  { %v3510_v3 = vpop.f32.mrb[4].mxu0 }
 0x51f   :  { %v4724_v4 = vadd.f32 %v3510_v3, %v3251_v2  ;;  %v695_v5 = vpop.f32.mrb[5].mxu0 }
 0x520   :  { %v4726_v6 = vadd.f32 %v3251_v2, %v695_v5 }
 0x522   :  { %v780_v7 = vadd.f32 %v777_v0, %v4726_v6 }
 0x524   :  { %v3255_v8 = vmul.f32 -1.442695, %v780_v7 }
 0x526   :  { %4026 = vpow2.f32 %v3255_v8 }
 0x530   :  { %v4027_v9 = vpop.eup %4026 }
 0x531   :  { %v784_v10 = vadd.f32 1.0, %v4027_v9 }
 0x533   :  { %4028 = vrcp.f32 %v784_v10 }
 0x53d   :  { %v4029_v12 = vpop.eup %4028 }
 0x53e   :  { %v791_v13 = vmul.f32 %v4029_v12, %v789_v11  ;;  %v798_v31 = vsub.f32 1.0, %v4029_v12 }
 0x540   :  { %793 = vrot.lane.b32.xlu0 %v791_v13, %s4398_s7 }
 0x5b2   :  { %v794_v14 = vpop.permute.xlu0 %793 }
 0x5b3   :  { %v796_v15 = vadd.f32 %v794_v14, %v4726_v6 }
 0x5b5   :  { %4030 = vtanh.f32 %v796_v15 }
 0x5bf   :  { %v4031_v27 = vpop.eup %4030 }
 0x5c0   :  { %800 = vrot.lane.b32.xlu1 %v4031_v27, %s4399_s8 }
 0x5c4   :  { %804 = vrot.lane.b32.xlu1 %v4696_v53, %s5201_s10 }
 0x632   :  { %v801_v30 = vpop.permute.xlu1 %800 }
 0x633   :  { %v803_v33 = vmul.f32 %v801_v30, %v798_v31 }
 0x636   :  { %v805_v32 = vpop.permute.xlu1 %804 }
 0x637   :  { %v807_v34 = vmul.f32 %v4029_v12, %v805_v32 }
 0x639   :  { %v4772_v36 = vadd.f32 %v807_v34, %v803_v33 }
 0x63b   :  { %810 = vrot.lane.b32.xlu0 %v4772_v36, %s4399_s8  ;;  %v1082_v12 = vrot.slane %v4772_v36, 6 }
 0x63f   :  { %965 = vrot.lane.b32.xlu0 %v954_v39, %s4398_s7 }
 0x6ad   :  { %v811_v41 = vpop.permute.xlu0 %810 }
 0x6ae   :  { %3531 = vmatmul.mubr.msk.f32.vlgmr.msra.gmra.mrb[6].mxu0 %vm305_vm2, %v811_v41 }
 0x6af   :  { %3860 = vmatpush3.bf16.msra.mxu0 %v4685_v47  ;;  %3552 = vmatprep.mubr.msk.f32.mxu0 %vm4396_vm3, %v4397_v52 }
 0x6b0   :  { %3861 = vmatprep.subr.bf16.mxu0 %v4395_v35 }
 0x6b1   :  { %v966_v57 = vpop.permute.xlu0 %965 }
 0x6b3   :  { %3863 = vmatpush3.bf16.msra.mxu0 %v4690_v51 }
 0x6b4   :  { %3870 = vmatprep.subr.bf16.mxu0 %v4395_v35 }
 0x6b6   :  { %3553 = vmatmul.mubr.msk.f32.vlgmr.msra.gmra.mrb[8].mxu0 %vm305_vm2, %v811_v41 }
 0x6b7   :  { %3872 = vmatpush3.bf16.msra.mxu0 %v4731_v19  ;;  %3574 = vmatprep.mubr.msk.f32.mxu0 %vm4396_vm3, %v4397_v52 }
 0x6b8   :  { %3873 = vmatprep.subr.bf16.mxu0 %v4395_v35 }
 0x6bb   :  { %3875 = vmatpush3.bf16.msra.mxu0 %v4746_v25 }
 0x6bc   :  { %3882 = vmatprep.subr.bf16.mxu0 %v4395_v35 }
 0x781   :  { %v880_v43 = vpop.f32.mrb[6].mxu0 }
 0x782   :  { %v881_v44 = vadd.f32 %v4800_v42, %v880_v43  ;;  %v3532_v45 = vpop.f32.mrb[7].mxu0 }
 0x784   :  { %v957_v46 = vadd.f32 %v954_v39, %v881_v44 }
 0x786   :  { %v3258_v48 = vmul.f32 -1.442695, %v957_v46 }
 0x788   :  { %4032 = vpow2.f32 %v3258_v48 }
 0x789   :  { %v1052_v49 = vpop.f32.mrb[8].mxu0 }
 0x78a   :  { %v1053_v50 = vadd.f32 %v4715_v62, %v1052_v49  ;;  %v3554_v53 = vpop.f32.mrb[9].mxu0 }
 0x78c   :  { %v1057_v54 = vrot.slane %v1053_v50, 6 }
 0x78e   :  { %1066 = vrot.lane.b32.xlu1 %v1057_v54, %s4398_s7  ;;  %v1059_v60 = vadd.f32 %v1057_v54, %v4726_v6 }
 0x790   :  { %v3260_v61 = vmul.f32 -1.442695, %v1059_v60 }
 0x792   :  { %v4033_v55 = vpop.eup %4032 }
 0x793   :  { %v961_v56 = vadd.f32 1.0, %v4033_v55 }
 0x795   :  { %4034 = vrcp.f32 %v961_v56 }
 0x796   :  { %4036 = vpow2.f32 %v3260_v61 }
 0x79f   :  { %v4035_v58 = vpop.eup %4034 }
 0x7a0   :  { %v968_v59 = vmul.f32 %v4035_v58, %v966_v57  ;;  %v4037_v63 = vpop.eup %4036  ;;  %v975_v18 = vsub.f32 1.0, %v4035_v58 }
 0x7a1   :  { %v1063_v0 = vadd.f32 1.0, %v4037_v63 }
 0x7a2   :  { %970 = vrot.lane.b32.xlu0 %v968_v59, %s4398_s7 }
 0x7a3   :  { %4038 = vrcp.f32 %v1063_v0 }
 0x7ad   :  { %v4039_v1 = vpop.eup %4038 }
 0x7ae   :  { %v1076_v13 = vsub.f32 1.0, %v4039_v1  ;;  %v1084_v16 = vmul.f32 %v4039_v1, %v1082_v12 }
 0x800   :  { %v1067_v2 = vpop.permute.xlu1 %1066 }
 0x801   :  { %v1069_v3 = vmul.f32 %v4039_v1, %v1067_v2 }
 0x803   :  { %1071 = vrot.lane.b32.xlu1 %v1069_v3, %s4398_s7 }
 0x814   :  { %v971_v5 = vpop.permute.xlu0 %970 }
 0x815   :  { %v973_v7 = vadd.f32 %v971_v5, %v881_v44 }
 0x817   :  { %4040 = vtanh.f32 %v973_v7 }
 0x821   :  { %v4041_v8 = vpop.eup %4040 }
 0x822   :  { %977 = vrot.lane.b32.xlu0 %v4041_v8, %s4399_s8 }
 0x875   :  { %v1072_v9 = vpop.permute.xlu1 %1071 }
 0x876   :  { %v1074_v10 = vadd.f32 %v1072_v9, %v4726_v6 }
 0x878   :  { %4042 = vtanh.f32 %v1074_v10 }
 0x882   :  { %v4043_v11 = vpop.eup %4042 }
 0x883   :  { %1078 = vrot.lane.b32.xlu1 %v4043_v11, %s4399_s8 }
 0x887   :  { %981 = vrot.lane.b32.xlu1 %v4757_v29, %s5201_s10 }
 0x894   :  { %v978_v17 = vpop.permute.xlu0 %977 }
 0x895   :  { %v980_v22 = vmul.f32 %v978_v17, %v975_v18 }
 0x8f5   :  { %v1079_v14 = vpop.permute.xlu1 %1078 }
 0x8f6   :  { %v1081_v15 = vmul.f32 %v1079_v14, %v1076_v13 }
 0x8f8   :  { %v4814_v20 = vadd.f32 %v1084_v16, %v1081_v15 }
 0x8f9   :  { %v982_v21 = vpop.permute.xlu1 %981 }
 0x8fa   :  { %v984_v23 = vmul.f32 %v4035_v58, %v982_v21  ;;  %v1087_v24 = vrot.slane %v4814_v20, 2  ;;  %v1359_v11 = vrot.slane %v4814_v20, 6 }
 0x8fc   :  { %v4817_v27 = vadd.f32 %v984_v23, %v980_v22  ;;  %1088 = vrot.lane.b32.xlu0 %v1087_v24, %s4399_s8 }
 0x8fe   :  { %1163 = vrot.lane.b32.xlu1 %v4817_v27, %s4399_s8 }
 0x96e   :  { %v1089_v29 = vpop.permute.xlu0 %1088 }
 0x96f   :  { %3564 = vmatmul.mubr.msk.f32.vlgmr.msra.gmra.mrb[8].mxu1 %vm305_vm2, %v1089_v29 }
 0x970   :  { %3878 = vmatpush3.bf16.msra.mxu1 %v4685_v47  ;;  %v1164_v30 = vpop.permute.xlu1 %1163  ;;  %3585 = vmatprep.mubr.msk.f32.mxu1 %vm4396_vm3, %v4397_v52 }
 0x971   :  { %3575 = vmatmul.mubr.msk.f32.vlgmr.msra.gmra.mrb[10].mxu0 %vm305_vm2, %v1164_v30  ;;  %3879 = vmatprep.subr.bf16.mxu1 %v4395_v35 }
 0x972   :  { %3884 = vmatpush3.bf16.msra.mxu0 %v4748_v26  ;;  %3596 = vmatprep.mubr.msk.f32.mxu0 %vm4396_vm3, %v4397_v52 }
 0x973   :  { %3885 = vmatprep.subr.bf16.mxu0 %v4395_v35 }
 0x974   :  { %3881 = vmatpush3.bf16.msra.mxu1 %v4690_v51 }
 0x975   :  { %3888 = vmatprep.subr.bf16.mxu1 %v4395_v35 }
 0x976   :  { %3887 = vmatpush3.bf16.msra.mxu0 %v4753_v28 }
 0x977   :  { %3586 = vmatmul.mubr.msk.f32.vlgmr.msra.gmra.mrb[10].mxu1 %vm305_vm2, %v1089_v29  ;;  %3894 = vmatprep.subr.bf16.mxu0 %v4395_v35 }
 0x978   :  { %3890 = vmatpush3.bf16.msra.mxu1 %v4731_v19  ;;  %3607 = vmatprep.mubr.msk.f32.mxu1 %vm4396_vm3, %v4397_v52 }
 0x979   :  { %3891 = vmatprep.subr.bf16.mxu1 %v4395_v35 }
 0x97c   :  { %3893 = vmatpush3.bf16.msra.mxu1 %v4746_v25 }
 0x97d   :  { %3900 = vmatprep.subr.bf16.mxu1 %v4395_v35 }
 0xa42   :  { %v1158_v31 = vpop.f32.mrb[8].mxu1 }
 0xa43   :  { %v3565_v32 = vpop.f32.mrb[9].mxu1  ;;  %v1159_v43 = vadd.f32 %v4800_v42, %v1158_v31 }
 0xa44   :  { %v1233_v33 = vpop.f32.mrb[10].mxu0 }
 0xa45   :  { %v1234_v34 = vadd.f32 %v4779_v37, %v1233_v33  ;;  %v3576_v36 = vpop.f32.mrb[11].mxu0 }
 0xa47   :  { %1245 = vrot.lane.b32.xlu1 %v1234_v34, %s4398_s7  ;;  %v1237_v44 = vadd.f32 %v1234_v34, %v1159_v43 }
 0xa49   :  { %v3263_v45 = vmul.f32 -1.442695, %v1237_v44 }
 0xa4a   :  { %v1329_v38 = vpop.f32.mrb[10].mxu1 }
 0xa4b   :  { %v1330_v39 = vadd.f32 %v4715_v62, %v1329_v38  ;;  %v3587_v40 = vpop.f32.mrb[11].mxu1  ;;  %4044 = vpow2.f32 %v3263_v45 }
 0xa4d   :  { %v1334_v41 = vrot.slane %v1330_v39, 4 }
 0xa4f   :  { %1343 = vrot.lane.b32.xlu0 %v1334_v41, %s4398_s7  ;;  %v1336_v46 = vadd.f32 %v1334_v41, %v4726_v6 }
 0xa51   :  { %v3265_v48 = vmul.f32 -1.442695, %v1336_v46 }
 0xa53   :  { %4046 = vpow2.f32 %v3265_v48 }
 0xa55   :  { %v4045_v49 = vpop.eup %4044 }
 0xa56   :  { %v1241_v50 = vadd.f32 1.0, %v4045_v49 }
 0xa58   :  { %4048 = vrcp.f32 %v1241_v50 }
 0xa5d   :  { %v4047_v53 = vpop.eup %4046 }
 0xa5e   :  { %v1340_v54 = vadd.f32 1.0, %v4047_v53 }
 0xa60   :  { %4050 = vrcp.f32 %v1340_v54 }
 0xa62   :  { %v4049_v55 = vpop.eup %4048 }
 0xa63   :  { %v1255_v5 = vsub.f32 1.0, %v4049_v55  ;;  %v1261_v8 = vmul.f32 %v4049_v55, %v4817_v27 }
 0xa6a   :  { %v4051_v58 = vpop.eup %4050 }
 0xa6b   :  { %v1353_v12 = vsub.f32 1.0, %v4051_v58  ;;  %v1361_v14 = vmul.f32 %v4051_v58, %v1359_v11 }
 0xab9   :  { %v1246_v56 = vpop.permute.xlu1 %1245 }
 0xaba   :  { %v1248_v57 = vmul.f32 %v4049_v55, %v1246_v56 }
 0xabc   :  { %1250 = vrot.lane.b32.xlu1 %v1248_v57, %s4398_s7 }
 0xac1   :  { %v1344_v59 = vpop.permute.xlu0 %1343 }
 0xac2   :  { %v1346_v60 = vmul.f32 %v4051_v58, %v1344_v59 }
 0xac4   :  { %1348 = vrot.lane.b32.xlu0 %v1346_v60, %s4398_s7 }
 0xb2e   :  { %v1251_v61 = vpop.permute.xlu1 %1250 }
 0xb2f   :  { %v1253_v63 = vadd.f32 %v1251_v61, %v1159_v43 }
 0xb31   :  { %4052 = vtanh.f32 %v1253_v63 }
 0xb36   :  { %v1349_v0 = vpop.permute.xlu0 %1348 }
 0xb37   :  { %v1351_v1 = vadd.f32 %v1349_v0, %v4726_v6 }
 0xb39   :  { %4054 = vtanh.f32 %v1351_v1 }
 0xb3b   :  { %v4053_v2 = vpop.eup %4052 }
 0xb3c   :  { %1257 = vrot.lane.b32.xlu1 %v4053_v2, %s4399_s8 }
 0xb43   :  { %v4055_v3 = vpop.eup %4054 }
 0xb44   :  { %1355 = vrot.lane.b32.xlu0 %v4055_v3, %s4399_s8 }
 0xbae   :  { %v1258_v7 = vpop.permute.xlu1 %1257 }
 0xbaf   :  { %v1260_v9 = vmul.f32 %v1258_v7, %v1255_v5 }
 0xbb1   :  { %v4855_v10 = vadd.f32 %v1261_v8, %v1260_v9 }
 0xbb3   :  { %1440 = vrot.lane.b32.xlu1 %v4855_v10, %s4399_s8 }
 0xbb6   :  { %v1356_v13 = vpop.permute.xlu0 %1355 }
 0xbb7   :  { %v1358_v15 = vmul.f32 %v1356_v13, %v1353_v12 }
 0xbb9   :  { %v4860_v16 = vadd.f32 %v1361_v14, %v1358_v15 }
 0xbbb   :  { %v1364_v17 = vrot.slane %v4860_v16, 4  ;;  %v1636_v2 = vrot.slane %v4860_v16, 6 }
 0xbbd   :  { %1365 = vrot.lane.b32.xlu0 %v1364_v17, %s4399_s8 }
 0xc25   :  { %v1441_v18 = vpop.permute.xlu1 %1440 }
 0xc26   :  { %3608 = vmatmul.mubr.msk.f32.vlgmr.msra.gmra.mrb[12].mxu1 %vm305_vm2, %v1441_v18 }
 0xc27   :  { %3902 = vmatpush3.bf16.msra.mxu1 %v4748_v26  ;;  %3629 = vmatprep.mubr.msk.f32.mxu1 %vm4396_vm3, %v4397_v52 }
 0xc28   :  { %3903 = vmatprep.subr.bf16.mxu1 %v4395_v35 }
 0xc2b   :  { %3905 = vmatpush3.bf16.msra.mxu1 %v4753_v28 }
 0xc2c   :  { %3912 = vmatprep.subr.bf16.mxu1 %v4395_v35 }
 0xc2f   :  { %v1366_v20 = vpop.permute.xlu0 %1365 }
 0xc30   :  { %3597 = vmatmul.mubr.msk.f32.vlgmr.msra.gmra.mrb[12].mxu0 %vm305_vm2, %v1366_v20 }
 0xc31   :  { %3896 = vmatpush3.bf16.msra.mxu0 %v4685_v47  ;;  %3618 = vmatprep.mubr.msk.f32.mxu0 %vm4396_vm3, %v4397_v52 }
 0xc32   :  { %3897 = vmatprep.subr.bf16.mxu0 %v4395_v35 }
 0xc35   :  { %3899 = vmatpush3.bf16.msra.mxu0 %v4690_v51 }
 0xc36   :  { %3906 = vmatprep.subr.bf16.mxu0 %v4395_v35 }
 0xc38   :  { %3619 = vmatmul.mubr.msk.f32.vlgmr.msra.gmra.mrb[14].mxu0 %vm305_vm2, %v1366_v20 }
 0xc39   :  { %3908 = vmatpush3.bf16.msra.mxu0 %v4731_v19  ;;  %3640 = vmatprep.mubr.msk.f32.mxu0 %vm4396_vm3, %v4397_v52 }
 0xc3a   :  { %3909 = vmatprep.subr.bf16.mxu0 %v4395_v35 }
 0xc3d   :  { %3911 = vmatpush3.bf16.msra.mxu0 %v4746_v25 }
 0xc3e   :  { %3918 = vmatprep.subr.bf16.mxu0 %v4395_v35 }
 0xcf9   :  { %v1510_v21 = vpop.f32.mrb[12].mxu1 }
 0xcfa   :  { %v1511_v22 = vadd.f32 %v4779_v37, %v1510_v21  ;;  %v3609_v23 = vpop.f32.mrb[13].mxu1 }
 0xcfc   :  { %1522 = vrot.lane.b32.xlu1 %v1511_v22, %s4398_s7 }
 0xd03   :  { %v1435_v24 = vpop.f32.mrb[12].mxu0 }
 0xd04   :  { %v3598_v27 = vpop.f32.mrb[13].mxu0  ;;  %v1436_v33 = vadd.f32 %v4800_v42, %v1435_v24 }
 0xd06   :  { %v1514_v34 = vadd.f32 %v1511_v22, %v1436_v33 }
 0xd08   :  { %v3268_v36 = vmul.f32 -1.442695, %v1514_v34 }
 0xd0a   :  { %4056 = vpow2.f32 %v3268_v36 }
 0xd0b   :  { %v1606_v29 = vpop.f32.mrb[14].mxu0 }
 0xd0c   :  { %v1607_v30 = vadd.f32 %v4715_v62, %v1606_v29  ;;  %v3620_v31 = vpop.f32.mrb[15].mxu0 }
 0xd0e   :  { %v1611_v32 = vrot.slane %v1607_v30, 2 }
 0xd10   :  { %1620 = vrot.lane.b32.xlu0 %v1611_v32, %s4398_s7  ;;  %v1613_v39 = vadd.f32 %v1611_v32, %v4726_v6 }
 0xd12   :  { %v3270_v41 = vmul.f32 -1.442695, %v1613_v39 }
 0xd14   :  { %v4057_v38 = vpop.eup %4056 }
 0xd15   :  { %v1518_v40 = vadd.f32 1.0, %v4057_v38 }
 0xd17   :  { %4058 = vrcp.f32 %v1518_v40 }
 0xd18   :  { %4060 = vpow2.f32 %v3270_v41 }
 0xd21   :  { %v4059_v43 = vpop.eup %4058 }
 0xd22   :  { %v4061_v46 = vpop.eup %4060  ;;  %v1532_v60 = vsub.f32 1.0, %v4059_v43  ;;  %v1538_v63 = vmul.f32 %v4059_v43, %v4855_v10 }
 0xd23   :  { %v1617_v48 = vadd.f32 1.0, %v4061_v46 }
 0xd25   :  { %4062 = vrcp.f32 %v1617_v48 }
 0xd2f   :  { %v4063_v49 = vpop.eup %4062 }
 0xd30   :  { %v1630_v3 = vsub.f32 1.0, %v4063_v49  ;;  %v1638_v7 = vmul.f32 %v4063_v49, %v1636_v2 }
 0xd6e   :  { %v1523_v44 = vpop.permute.xlu1 %1522 }
 0xd6f   :  { %v1525_v45 = vmul.f32 %v4059_v43, %v1523_v44 }
 0xd71   :  { %1527 = vrot.lane.b32.xlu1 %v1525_v45, %s4398_s7 }
 0xd82   :  { %v1621_v50 = vpop.permute.xlu0 %1620 }
 0xd83   :  { %v1623_v53 = vmul.f32 %v4063_v49, %v1621_v50 }
 0xd85   :  { %1625 = vrot.lane.b32.xlu0 %v1623_v53, %s4398_s7 }
 0xde3   :  { %v1528_v54 = vpop.permute.xlu1 %1527 }
 0xde4   :  { %v1530_v55 = vadd.f32 %v1528_v54, %v1436_v33 }
 0xde6   :  { %4064 = vtanh.f32 %v1530_v55 }
 0xdf0   :  { %v4065_v56 = vpop.eup %4064 }
 0xdf1   :  { %1534 = vrot.lane.b32.xlu1 %v4065_v56, %s4399_s8 }
 0xdf7   :  { %v1626_v57 = vpop.permute.xlu0 %1625 }
 0xdf8   :  { %v1628_v58 = vadd.f32 %v1626_v57, %v4726_v6 }
 0xdfa   :  { %4066 = vtanh.f32 %v1628_v58 }
 0xe04   :  { %v4067_v59 = vpop.eup %4066 }
 0xe05   :  { %1632 = vrot.lane.b32.xlu0 %v4067_v59, %s4399_s8 }
 0xe63   :  { %v1535_v61 = vpop.permute.xlu1 %1534 }
 0xe64   :  { %v1537_v0 = vmul.f32 %v1535_v61, %v1532_v60 }
 0xe66   :  { %v4897_v1 = vadd.f32 %v1538_v63, %v1537_v0 }
 0xe68   :  { %1717 = vrot.lane.b32.xlu1 %v4897_v1, %s4399_s8 }
 0xe77   :  { %v1633_v5 = vpop.permute.xlu0 %1632 }
 0xe78   :  { %v1635_v6 = vmul.f32 %v1633_v5, %v1630_v3 }
 0xe7a   :  { %v4902_v8 = vadd.f32 %v1638_v7, %v1635_v6 }
 0xe7c   :  { %v1641_v9 = vrot.slane %v4902_v8, 6 }
 0xe7e   :  { %1642 = vrot.lane.b32.xlu0 %v1641_v9, %s4399_s8 }
 0xeda   :  { %v1718_v10 = vpop.permute.xlu1 %1717 }
 0xedb   :  { %3641 = vmatmul.mubr.msk.f32.vlgmr.msra.gmra.mrb[16].mxu0 %vm305_vm2, %v1718_v10 }
 0xedc   :  { %3920 = vmatpush3.bf16.msra.mxu0 %v4748_v26  ;;  %3662 = vmatprep.mubr.msk.f32.mxu0 %vm4396_vm3, %v4397_v52 }
 0xedd   :  { %3921 = vmatprep.subr.bf16.mxu0 %v4395_v35 }
 0xee0   :  { %3923 = vmatpush3.bf16.msra.mxu0 %v4753_v28 }
 0xee1   :  { %3930 = vmatprep.subr.bf16.mxu0 %v4395_v35 }
 0xef0   :  { %v1643_v11 = vpop.permute.xlu0 %1642 }
 0xef1   :  { %3630 = vmatmul.mubr.msk.f32.vlgmr.msra.gmra.mrb[14].mxu1 %vm305_vm2, %v1643_v11 }
 0xef2   :  { %3914 = vmatpush3.bf16.msra.mxu1 %v4685_v47  ;;  %3651 = vmatprep.mubr.msk.f32.mxu1 %vm4396_vm3, %v4397_v52 }
 0xef3   :  { %3915 = vmatprep.subr.bf16.mxu1 %v4395_v35 }
 0xef6   :  { %3917 = vmatpush3.bf16.msra.mxu1 %v4690_v51 }
 0xef7   :  { %3924 = vmatprep.subr.bf16.mxu1 %v4395_v35 }
 0xef9   :  { %3652 = vmatmul.mubr.msk.f32.vlgmr.msra.gmra.mrb[16].mxu1 %vm305_vm2, %v1643_v11 }
 0xefa   :  { %3926 = vmatpush3.bf16.msra.mxu1 %v4731_v19  ;;  %3673 = vmatprep.mubr.msk.f32.mxu1 %vm4396_vm3, %v4397_v52 }
 0xefb   :  { %3927 = vmatprep.subr.bf16.mxu1 %v4395_v35 }
 0xefe   :  { %3929 = vmatpush3.bf16.msra.mxu1 %v4746_v25 }
 0xeff   :  { %3936 = vmatprep.subr.bf16.mxu1 %v4395_v35 }
 0xfae   :  { %v1787_v12 = vpop.f32.mrb[16].mxu0 }
 0xfaf   :  { %v1788_v13 = vadd.f32 %v4779_v37, %v1787_v12  ;;  %v3642_v14 = vpop.f32.mrb[17].mxu0 }
 0xfb1   :  { %1799 = vrot.lane.b32.xlu1 %v1788_v13, %s4398_s7 }
 0xfc4   :  { %v1712_v15 = vpop.f32.mrb[14].mxu1 }
 0xfc5   :  { %v3631_v16 = vpop.f32.mrb[15].mxu1  ;;  %v1713_v21 = vadd.f32 %v4800_v42, %v1712_v15 }
 0xfc7   :  { %v1791_v22 = vadd.f32 %v1788_v13, %v1713_v21 }
 0xfc9   :  { %v3273_v23 = vmul.f32 -1.442695, %v1791_v22 }
 0xfcb   :  { %4068 = vpow2.f32 %v3273_v23 }
 0xfcc   :  { %v1883_v17 = vpop.f32.mrb[16].mxu1 }
 0xfcd   :  { %v1884_v18 = vadd.f32 %v4715_v62, %v1883_v17  ;;  %v3653_v20 = vpop.f32.mrb[17].mxu1 }
 0xfcf   :  { %1895 = vrot.lane.b32.xlu0 %v1884_v18, %s4398_s7  ;;  %v1887_v29 = vadd.f32 %v1884_v18, %v4724_v4 }
 0xfd1   :  { %v3275_v30 = vmul.f32 -1.442695, %v1887_v29 }
 0xfd5   :  { %v4069_v24 = vpop.eup %4068 }
 0xfd6   :  { %v1795_v27 = vadd.f32 1.0, %v4069_v24 }
 0xfd8   :  { %4070 = vrcp.f32 %v1795_v27 }
 0xfd9   :  { %4072 = vpow2.f32 %v3275_v30 }
 0xfe2   :  { %v4071_v31 = vpop.eup %4070 }
 0xfe3   :  { %v4073_v34 = vpop.eup %4072  ;;  %v1809_v49 = vsub.f32 1.0, %v4071_v31  ;;  %v1815_v53 = vmul.f32 %v4071_v31, %v4897_v1 }
 0xfe4   :  { %v1891_v36 = vadd.f32 1.0, %v4073_v34 }
 0xfe6   :  { %4074 = vrcp.f32 %v1891_v36 }
 0xff0   :  { %v4075_v38 = vpop.eup %4074 }
 0xff1   :  { %v1905_v56 = vsub.f32 1.0, %v4075_v38  ;;  %v1912_v58 = vmul.f32 %v4075_v38, %v1641_v9 }
0x1023   :  { %v1800_v32 = vpop.permute.xlu1 %1799 }
0x1024   :  { %v1802_v33 = vmul.f32 %v4071_v31, %v1800_v32 }
0x1026   :  { %1804 = vrot.lane.b32.xlu1 %v1802_v33, %s4398_s7 }
0x1041   :  { %v1896_v39 = vpop.permute.xlu0 %1895 }
0x1042   :  { %v1898_v40 = vmul.f32 %v4075_v38, %v1896_v39 }
0x1044   :  { %1900 = vrot.lane.b32.xlu0 %v1898_v40, %s4398_s7 }
0x1098   :  { %v1805_v41 = vpop.permute.xlu1 %1804 }
0x1099   :  { %v1807_v43 = vadd.f32 %v1805_v41, %v1713_v21 }
0x109b   :  { %4076 = vtanh.f32 %v1807_v43 }
0x10a5   :  { %v4077_v44 = vpop.eup %4076 }
0x10a6   :  { %1811 = vrot.lane.b32.xlu1 %v4077_v44, %s4399_s8 }
0x10b6   :  { %v1901_v45 = vpop.permute.xlu0 %1900 }
0x10b7   :  { %v1903_v46 = vadd.f32 %v1901_v45, %v4724_v4 }
0x10b9   :  { %4078 = vtanh.f32 %v1903_v46 }
0x10c3   :  { %v4079_v48 = vpop.eup %4078 }
0x10c4   :  { %1907 = vrot.lane.b32.xlu0 %v4079_v48, %s4399_s8 }
0x1118   :  { %v1812_v50 = vpop.permute.xlu1 %1811 }
0x1119   :  { %v1814_v54 = vmul.f32 %v1812_v50, %v1809_v49 }
0x111b   :  { %v4941_v55 = vadd.f32 %v1815_v53, %v1814_v54 }
0x111d   :  { %1990 = vrot.lane.b32.xlu1 %v4941_v55, %s4399_s8 }
0x1136   :  { %v1908_v57 = vpop.permute.xlu0 %1907 }
0x1137   :  { %v1910_v59 = vmul.f32 %v1908_v57, %v1905_v56 }
0x1139   :  { %v4947_v60 = vadd.f32 %v1912_v58, %v1910_v59 }
0x113b   :  { %1915 = vrot.lane.b32.xlu0 %v4947_v60, %s4399_s8  ;;  %v2186_v43 = vrot.slane %v4947_v60, 6 }
0x118f   :  { %v1991_v61 = vpop.permute.xlu1 %1990 }
0x1190   :  { %3674 = vmatmul.mubr.msk.f32.vlgmr.msra.gmra.mrb[18].mxu1 %vm305_vm2, %v1991_v61 }
0x1191   :  { %3938 = vmatpush3.bf16.msra.mxu1 %v4748_v26  ;;  %3695 = vmatprep.mubr.msk.f32.mxu1 %vm4396_vm3, %v4397_v52 }
0x1192   :  { %3939 = vmatprep.subr.bf16.mxu1 %v4395_v35 }
0x1195   :  { %3941 = vmatpush3.bf16.msra.mxu1 %v4753_v28 }
0x1196   :  { %3948 = vmatprep.subr.bf16.mxu1 %v4395_v35 }
0x11ad   :  { %v1916_v63 = vpop.permute.xlu0 %1915 }
0x11ae   :  { %3663 = vmatmul.mubr.msk.f32.vlgmr.msra.gmra.mrb[18].mxu0 %vm305_vm2, %v1916_v63 }
0x11af   :  { %3932 = vmatpush3.bf16.msra.mxu0 %v4685_v47  ;;  %3684 = vmatprep.mubr.msk.f32.mxu0 %vm4396_vm3, %v4397_v52 }
0x11b0   :  { %3933 = vmatprep.subr.bf16.mxu0 %v4395_v35 }
0x11b3   :  { %3935 = vmatpush3.bf16.msra.mxu0 %v4690_v51 }
0x11b4   :  { %3942 = vmatprep.subr.bf16.mxu0 %v4395_v35 }
0x11b6   :  { %3685 = vmatmul.mubr.msk.f32.vlgmr.msra.gmra.mrb[20].mxu0 %vm305_vm2, %v1916_v63 }
0x11b7   :  { %3944 = vmatpush3.bf16.msra.mxu0 %v4731_v19  ;;  %3706 = vmatprep.mubr.msk.f32.mxu0 %vm4396_vm3, %v4397_v52 }
0x11b8   :  { %3945 = vmatprep.subr.bf16.mxu0 %v4395_v35 }
0x11bb   :  { %3947 = vmatpush3.bf16.msra.mxu0 %v4746_v25 }
0x11bc   :  { %3954 = vmatprep.subr.bf16.mxu0 %v4395_v35 }
0x1263   :  { %v2060_v0 = vpop.f32.mrb[18].mxu1 }
0x1264   :  { %v2061_v1 = vadd.f32 %v4779_v37, %v2060_v0  ;;  %v3675_v2 = vpop.f32.mrb[19].mxu1 }
0x1266   :  { %2072 = vrot.lane.b32.xlu0 %v2061_v1, %s4398_s7 }
0x1281   :  { %v1985_v3 = vpop.f32.mrb[18].mxu0 }
0x1282   :  { %v3664_v5 = vpop.f32.mrb[19].mxu0  ;;  %v1986_v10 = vadd.f32 %v4800_v42, %v1985_v3 }
0x1284   :  { %v2064_v11 = vadd.f32 %v2061_v1, %v1986_v10 }
0x1286   :  { %v3278_v12 = vmul.f32 -1.442695, %v2064_v11 }
0x1288   :  { %4080 = vpow2.f32 %v3278_v12 }
0x1289   :  { %v2156_v7 = vpop.f32.mrb[20].mxu0 }
0x128a   :  { %v2157_v6 = vadd.f32 %v4715_v62, %v2156_v7  ;;  %v3686_v8 = vpop.f32.mrb[21].mxu0 }
0x128c   :  { %v2161_v9 = vrot.slane %v2157_v6, 6 }
0x128e   :  { %2170 = vrot.lane.b32.xlu1 %v2161_v9, %s4398_s7  ;;  %v2163_v18 = vadd.f32 %v2161_v9, %v4724_v4 }
0x1290   :  { %v3280_v20 = vmul.f32 -1.442695, %v2163_v18 }
0x1292   :  { %v4081_v13 = vpop.eup %4080 }
0x1293   :  { %v2068_v14 = vadd.f32 1.0, %v4081_v13 }
0x1295   :  { %4082 = vrcp.f32 %v2068_v14 }
0x1296   :  { %4084 = vpow2.f32 %v3280_v20 }
0x129f   :  { %v4083_v15 = vpop.eup %4082 }
0x12a0   :  { %v4085_v21 = vpop.eup %4084  ;;  %v2082_v36 = vsub.f32 1.0, %v4083_v15  ;;  %v2088_v39 = vmul.f32 %v4083_v15, %v4941_v55 }
0x12a1   :  { %v2167_v22 = vadd.f32 1.0, %v4085_v21 }
0x12a3   :  { %4086 = vrcp.f32 %v2167_v22 }
0x12ad   :  { %v4087_v23 = vpop.eup %4086 }
0x12ae   :  { %v2180_v44 = vsub.f32 1.0, %v4087_v23  ;;  %v2188_v48 = vmul.f32 %v4087_v23, %v2186_v43 }
0x12d8   :  { %v2073_v16 = vpop.permute.xlu0 %2072 }
0x12d9   :  { %v2075_v17 = vmul.f32 %v4083_v15, %v2073_v16 }
0x12db   :  { %2077 = vrot.lane.b32.xlu0 %v2075_v17, %s4398_s7 }
0x1300   :  { %v2171_v24 = vpop.permute.xlu1 %2170 }
0x1301   :  { %v2173_v27 = vmul.f32 %v4087_v23, %v2171_v24 }
0x1303   :  { %2175 = vrot.lane.b32.xlu1 %v2173_v27, %s4398_s7 }
0x134d   :  { %v2078_v29 = vpop.permute.xlu0 %2077 }
0x134e   :  { %v2080_v30 = vadd.f32 %v2078_v29, %v1986_v10 }
0x1350   :  { %4088 = vtanh.f32 %v2080_v30 }
0x135a   :  { %v4089_v31 = vpop.eup %4088 }
0x135b   :  { %2084 = vrot.lane.b32.xlu0 %v4089_v31, %s4399_s8 }
0x1375   :  { %v2176_v32 = vpop.permute.xlu1 %2175 }
0x1376   :  { %v2178_v33 = vadd.f32 %v2176_v32, %v4724_v4 }
0x1378   :  { %4090 = vtanh.f32 %v2178_v33 }
0x1382   :  { %v4091_v34 = vpop.eup %4090 }
0x1383   :  { %2182 = vrot.lane.b32.xlu1 %v4091_v34, %s4399_s8 }
0x13cd   :  { %v2085_v38 = vpop.permute.xlu0 %2084 }
0x13ce   :  { %v2087_v40 = vmul.f32 %v2085_v38, %v2082_v36 }
0x13d0   :  { %v4984_v41 = vadd.f32 %v2088_v39, %v2087_v40 }
0x13d2   :  { %2267 = vrot.lane.b32.xlu0 %v4984_v41, %s4399_s8 }
0x13f5   :  { %v2183_v45 = vpop.permute.xlu1 %2182 }
0x13f6   :  { %v2185_v46 = vmul.f32 %v2183_v45, %v2180_v44 }
0x13f8   :  { %v4989_v49 = vadd.f32 %v2188_v48, %v2185_v46 }
0x13fa   :  { %v2191_v50 = vrot.slane %v4989_v49, 2  ;;  %v2463_v31 = vrot.slane %v4989_v49, 6 }
0x13fc   :  { %2192 = vrot.lane.b32.xlu1 %v2191_v50, %s4399_s8 }
0x1444   :  { %v2268_v53 = vpop.permute.xlu0 %2267 }
0x1445   :  { %3707 = vmatmul.mubr.msk.f32.vlgmr.msra.gmra.mrb[22].mxu0 %vm305_vm2, %v2268_v53 }
0x1446   :  { %3956 = vmatpush3.bf16.msra.mxu0 %v4748_v26  ;;  %3728 = vmatprep.mubr.msk.f32.mxu0 %vm4396_vm3, %v4397_v52 }
0x1447   :  { %3957 = vmatprep.subr.bf16.mxu0 %v4395_v35 }
0x144a   :  { %3959 = vmatpush3.bf16.msra.mxu0 %v4753_v28 }
0x144b   :  { %3966 = vmatprep.subr.bf16.mxu0 %v4395_v35 }
0x146e   :  { %v2193_v54 = vpop.permute.xlu1 %2192 }
0x146f   :  { %3696 = vmatmul.mubr.msk.f32.vlgmr.msra.gmra.mrb[20].mxu1 %vm305_vm2, %v2193_v54 }
0x1470   :  { %3950 = vmatpush3.bf16.msra.mxu1 %v4685_v47  ;;  %3717 = vmatprep.mubr.msk.f32.mxu1 %vm4396_vm3, %v4397_v52 }
0x1471   :  { %3951 = vmatprep.subr.bf16.mxu1 %v4395_v35 }
0x1474   :  { %3953 = vmatpush3.bf16.msra.mxu1 %v4690_v51 }
0x1475   :  { %3960 = vmatprep.subr.bf16.mxu1 %v4395_v35 }
0x1477   :  { %3718 = vmatmul.mubr.msk.f32.vlgmr.msra.gmra.mrb[22].mxu1 %vm305_vm2, %v2193_v54 }
0x1478   :  { %3962 = vmatpush3.bf16.msra.mxu1 %v4731_v19  ;;  %3739 = vmatprep.mubr.msk.f32.mxu1 %vm4396_vm3, %v4397_v52 }
0x1479   :  { %3963 = vmatprep.subr.bf16.mxu1 %v4395_v35 }
0x147c   :  { %3965 = vmatpush3.bf16.msra.mxu1 %v4746_v25 }
0x147d   :  { %3972 = vmatprep.subr.bf16.mxu1 %v4395_v35 }
0x1518   :  { %v2337_v55 = vpop.f32.mrb[22].mxu0 }
0x1519   :  { %v2338_v56 = vadd.f32 %v4779_v37, %v2337_v55  ;;  %v3708_v57 = vpop.f32.mrb[23].mxu0 }
0x151b   :  { %2349 = vrot.lane.b32.xlu0 %v2338_v56, %s4398_s7 }
0x1542   :  { %v2262_v58 = vpop.f32.mrb[20].mxu1 }
0x1543   :  { %v3697_v59 = vpop.f32.mrb[21].mxu1  ;;  %v2263_v1 = vadd.f32 %v4800_v42, %v2262_v58 }
0x1545   :  { %v2341_v2 = vadd.f32 %v2338_v56, %v2263_v1 }
0x1547   :  { %v3283_v3 = vmul.f32 -1.442695, %v2341_v2 }
0x1549   :  { %4092 = vpow2.f32 %v3283_v3 }
0x154a   :  { %v2433_v60 = vpop.f32.mrb[22].mxu1 }
0x154b   :  { %v2434_v61 = vadd.f32 %v4715_v62, %v2433_v60  ;;  %v3719_v63 = vpop.f32.mrb[23].mxu1 }
0x154d   :  { %v2438_v0 = vrot.slane %v2434_v61, 4 }
0x154f   :  { %2447 = vrot.lane.b32.xlu1 %v2438_v0, %s4398_s7  ;;  %v2440_v10 = vadd.f32 %v2438_v0, %v4724_v4 }
0x1551   :  { %v3285_v62 = vmul.f32 -1.442695, %v2440_v10 }
0x1553   :  { %v4093_v5 = vpop.eup %4092 }
0x1554   :  { %v2345_v7 = vadd.f32 1.0, %v4093_v5 }
0x1556   :  { %4094 = vrcp.f32 %v2345_v7 }
0x1557   :  { %4096 = vpow2.f32 %v3285_v62 }
0x1560   :  { %v4095_v6 = vpop.eup %4094 }
0x1561   :  { %v4097_v11 = vpop.eup %4096  ;;  %v2359_v23 = vsub.f32 1.0, %v4095_v6  ;;  %v2365_v27 = vmul.f32 %v4095_v6, %v4984_v41 }
0x1562   :  { %v2444_v12 = vadd.f32 1.0, %v4097_v11 }
0x1564   :  { %4098 = vrcp.f32 %v2444_v12 }
0x156e   :  { %v4099_v13 = vpop.eup %4098 }
0x156f   :  { %v2457_v32 = vsub.f32 1.0, %v4099_v13  ;;  %v2465_v34 = vmul.f32 %v4099_v13, %v2463_v31  ;;  %v4124_v31 = vld [vmem:[%s5171_s12 + $0x1] ss:$0 sm:$0xff] }
0x158d   :  { %v2350_v8 = vpop.permute.xlu0 %2349 }
0x158e   :  { %v2352_v9 = vmul.f32 %v4095_v6, %v2350_v8 }
0x1590   :  { %2354 = vrot.lane.b32.xlu0 %v2352_v9, %s4398_s7 }
0x15c1   :  { %v2448_v14 = vpop.permute.xlu1 %2447 }
0x15c2   :  { %v2450_v15 = vmul.f32 %v4099_v13, %v2448_v14 }
0x15c4   :  { %2452 = vrot.lane.b32.xlu1 %v2450_v15, %s4398_s7 }
0x1602   :  { %v2355_v16 = vpop.permute.xlu0 %2354 }
0x1603   :  { %v2357_v17 = vadd.f32 %v2355_v16, %v2263_v1 }
0x1605   :  { %4100 = vtanh.f32 %v2357_v17 }
0x160f   :  { %v4101_v18 = vpop.eup %4100 }
0x1610   :  { %2361 = vrot.lane.b32.xlu0 %v4101_v18, %s4399_s8 }
0x1636   :  { %v2453_v20 = vpop.permute.xlu1 %2452 }
0x1637   :  { %v2455_v21 = vadd.f32 %v2453_v20, %v4724_v4 }
0x1639   :  { %4102 = vtanh.f32 %v2455_v21 }
0x1643   :  { %v4103_v22 = vpop.eup %4102 }
0x1644   :  { %2459 = vrot.lane.b32.xlu1 %v4103_v22, %s4399_s8  ;;  %v4123_v22 = vld [vmem:[%s5172_s13 + $0x1] ss:$0 sm:$0xff] }
0x1682   :  { %v2362_v24 = vpop.permute.xlu0 %2361 }
0x1683   :  { %v2364_v29 = vmul.f32 %v2362_v24, %v2359_v23 }
0x1685   :  { %v5026_v30 = vadd.f32 %v2365_v27, %v2364_v29 }
0x1687   :  { %2544 = vrot.lane.b32.xlu0 %v5026_v30, %s4399_s8 }
0x16b6   :  { %v2460_v33 = vpop.permute.xlu1 %2459 }
0x16b7   :  { %v2462_v36 = vmul.f32 %v2460_v33, %v2457_v32 }
0x16b9   :  { %v5031_v38 = vadd.f32 %v2465_v34, %v2462_v36 }
0x16bb   :  { %v2468_v39 = vrot.slane %v5031_v38, 4  ;;  %v2740_v12 = vrot.slane %v5031_v38, 6 }
0x16bd   :  { %2469 = vrot.lane.b32.xlu1 %v2468_v39, %s4399_s8 }
0x16f9   :  { %v2545_v40 = vpop.permute.xlu0 %2544 }
0x16fa   :  { %3740 = vmatmul.mubr.msk.f32.vlgmr.msra.gmra.mrb[24].mxu1 %vm305_vm2, %v2545_v40 }
0x16fb   :  { %3974 = vmatpush3.bf16.msra.mxu1 %v4748_v26  ;;  %3761 = vmatprep.mubr.msk.f32.mxu1 %vm4396_vm3, %v4397_v52 }
0x16fc   :  { %3975 = vmatprep.subr.bf16.mxu1 %v4395_v35 }
0x16ff   :  { %3977 = vmatpush3.bf16.msra.mxu1 %v4753_v28 }
0x1700   :  { %3984 = vmatprep.subr.bf16.mxu1 %v4395_v35 }
0x172f   :  { %v2470_v43 = vpop.permute.xlu1 %2469 }
0x1730   :  { %3729 = vmatmul.mubr.msk.f32.vlgmr.msra.gmra.mrb[24].mxu0 %vm305_vm2, %v2470_v43 }
0x1731   :  { %3968 = vmatpush3.bf16.msra.mxu0 %v4685_v47  ;;  %3750 = vmatprep.mubr.msk.f32.mxu0 %vm4396_vm3, %v4397_v52 }
0x1732   :  { %3969 = vmatprep.subr.bf16.mxu0 %v4395_v35 }
0x1735   :  { %3971 = vmatpush3.bf16.msra.mxu0 %v4690_v51 }
0x1736   :  { %3978 = vmatprep.subr.bf16.mxu0 %v4395_v35 }
0x1738   :  { %3751 = vmatmul.mubr.msk.f32.vlgmr.msra.gmra.mrb[26].mxu0 %vm305_vm2, %v2470_v43 }
0x1739   :  { %3980 = vmatpush3.bf16.msra.mxu0 %v4731_v19  ;;  %3772 = vmatprep.mubr.msk.f32.mxu0 %vm4396_vm3, %v4397_v52  ;;  %v4122_v19 = vld [vmem:[%s5172_s13] ss:$0 sm:$0xff] }
0x173a   :  { %3981 = vmatprep.subr.bf16.mxu0 %v4395_v35 }
0x173d   :  { %3983 = vmatpush3.bf16.msra.mxu0 %v4746_v25 }
0x173e   :  { %3990 = vmatprep.subr.bf16.mxu0 %v4395_v35 }
0x17cd   :  { %v2614_v47 = vpop.f32.mrb[24].mxu1 }
0x17ce   :  { %v2615_v26 = vadd.f32 %v4779_v37, %v2614_v47  ;;  %v3741_v28 = vpop.f32.mrb[25].mxu1 }
0x17d0   :  { %2626 = vrot.lane.b32.xlu0 %v2615_v26, %s4398_s7 }
0x1803   :  { %v2539_v51 = vpop.f32.mrb[24].mxu0 }
0x1804   :  { %v3730_v44 = vpop.f32.mrb[25].mxu0  ;;  %v2540_v25 = vadd.f32 %v4800_v42, %v2539_v51  ;;  %v2945_v51 = vld [vmem:[%s5173_s14] sm:$0xff] }
0x1805   :  { %v2946_v44 = vld [vmem:[%s5173_s14 + $0x8] sm:$0xff] }
0x1806   :  { %v2618_v50 = vadd.f32 %v2615_v26, %v2540_v25 }
0x1808   :  { %v3288_v53 = vmul.f32 -1.442695, %v2618_v50  ;;  %v2933_v50 = vrot.slane %v5026_v30, 6 }
0x180a   :  { %4104 = vpow2.f32 %v3288_v53 }
0x180b   :  { %v2710_v45 = vpop.f32.mrb[26].mxu0 }
0x180c   :  { %v2711_v46 = vadd.f32 %v4122_v19, %v2710_v45  ;;  %v3752_v48 = vpop.f32.mrb[27].mxu0  ;;  %v2947_v45 = vld [vmem:[%s5173_s14 + $0x10] sm:$0xff]  ;;  %v3985_v19 = vpack.c.bf16 %v2946_v44, %v2945_v51 }
0x180e   :  { %v2715_v49 = vrot.slane %v2711_v46, 2  ;;  %v2948_v46 = vld [vmem:[%s5173_s14 + $0x18] sm:$0xff] }
0x180f   :  { %v3988_v48 = vpack.c.bf16 %v2948_v46, %v2947_v45 }
0x1810   :  { %2724 = vrot.lane.b32.xlu1 %v2715_v49, %s4398_s7  ;;  %v2717_v58 = vadd.f32 %v2715_v49, %v4724_v4 }
0x1812   :  { %v3290_v59 = vmul.f32 -1.442695, %v2717_v58 }
0x1814   :  { %v4105_v37 = vpop.eup %4104 }
0x1815   :  { %v2622_v54 = vadd.f32 1.0, %v4105_v37 }
0x1817   :  { %4106 = vrcp.f32 %v2622_v54  ;;  %v3032_v54 = vld [vmem:[#allocation17] sm:$0xff] }
0x1818   :  { %4108 = vpow2.f32 %v3290_v59 }
0x1821   :  { %v4107_v55 = vpop.eup %4106 }
0x1822   :  { %v4109_v60 = vpop.eup %4108  ;;  %v2636_v8 = vsub.f32 1.0, %v4107_v55  ;;  %v2642_v10 = vmul.f32 %v4107_v55, %v5026_v30 }
0x1823   :  { %v2721_v61 = vadd.f32 1.0, %v4109_v60 }
0x1825   :  { %4110 = vrcp.f32 %v2721_v61  ;;  %v2940_v61 = vsel %vm2939_vm5, %v4984_v41, %v2933_v50  ;;  %v3034_v41 = vld [vmem:[#allocation17 + $0x10] sm:$0xff] }
0x182f   :  { %v4111_v63 = vpop.eup %4110 }
0x1830   :  { %v2734_v13 = vsub.f32 1.0, %v4111_v63  ;;  %v2742_v15 = vmul.f32 %v4111_v63, %v2740_v12  ;;  %v3120_v12 = vld [vmem:[%s5177_s18 + $0x18] sm:$0xff] }
0x1842   :  { %v2627_v56 = vpop.permute.xlu0 %2626 }
0x1843   :  { %v2629_v57 = vmul.f32 %v4107_v55, %v2627_v56  ;;  %v3033_v55 = vld [vmem:[#allocation17 + $0x8] sm:$0xff] }
0x1845   :  { %2631 = vrot.lane.b32.xlu0 %v2629_v57, %s4398_s7  ;;  %v3991_v57 = vpack.c.bf16 %v3033_v55, %v3032_v54 }
0x1882   :  { %v2725_v42 = vpop.permute.xlu1 %2724 }
0x1883   :  { %v2727_v0 = vmul.f32 %v4111_v63, %v2725_v42 }
0x1885   :  { %2729 = vrot.lane.b32.xlu1 %v2727_v0, %s4398_s7 }
0x18b7   :  { %v2632_v1 = vpop.permute.xlu0 %2631 }
0x18b8   :  { %v2634_v2 = vadd.f32 %v2632_v1, %v2540_v25 }
0x18ba   :  { %4112 = vtanh.f32 %v2634_v2  ;;  %v3035_v2 = vld [vmem:[#allocation17 + $0x18] sm:$0xff] }
0x18c4   :  { %v4113_v3 = vpop.eup %4112 }
0x18c5   :  { %2638 = vrot.lane.b32.xlu0 %v4113_v3, %s4399_s8  ;;  %v3994_v3 = vpack.c.bf16 %v3035_v2, %v3034_v41 }
0x18f7   :  { %v2730_v5 = vpop.permute.xlu1 %2729 }
0x18f8   :  { %v2732_v7 = vadd.f32 %v2730_v5, %v4724_v4  ;;  %v3117_v5 = vld [vmem:[%s5177_s18] sm:$0xff] }
0x18fa   :  { %4114 = vtanh.f32 %v2732_v7  ;;  %v3118_v7 = vld [vmem:[%s5177_s18 + $0x8] sm:$0xff] }
0x1904   :  { %v4115_v6 = vpop.eup %4114 }
0x1905   :  { %2736 = vrot.lane.b32.xlu1 %v4115_v6, %s4399_s8  ;;  %v3997_v6 = vpack.c.bf16 %v3118_v7, %v3117_v5 }
0x1937   :  { %v2639_v9 = vpop.permute.xlu0 %2638 }
0x1938   :  { %v2641_v62 = vmul.f32 %v2639_v9, %v2636_v8 }
0x193a   :  { %v5070_v11 = vadd.f32 %v2642_v10, %v2641_v62 }
0x193c   :  { %2821 = vrot.lane.b32.xlu0 %v5070_v11, %s4399_s8  ;;  %v2935_v56 = vrot.slane %v5070_v11, 4 }
0x193e   :  { %v2942_v30 = vsel %vm2941_vm6, %v2940_v61, %v2935_v56 }
0x1977   :  { %v2737_v14 = vpop.permute.xlu1 %2736 }
0x1978   :  { %v2739_v4 = vmul.f32 %v2737_v14, %v2734_v13 }
0x197a   :  { %v2743_v16 = vadd.f32 %v2742_v15, %v2739_v4 }
0x197c   :  { %v2745_v17 = vrot.slane %v2743_v16, 6 }
0x197e   :  { %2746 = vrot.lane.b32.xlu1 %v2745_v17, %s4399_s8 }
0x19ae   :  { %v2822_v18 = vpop.permute.xlu0 %2821 }
0x19af   :  { %3773 = vmatmul.mubr.msk.f32.vlgmr.msra.gmra.mrb[28].mxu0 %vm305_vm2, %v2822_v18 }
0x19b0   :  { %3794 = vmatprep.mubr.msk.f32.mxu0 %vm4396_vm3, %v4397_v52  ;;  %3992 = vmatpush3.bf16.msra.mxu0 %v3991_v57 }
0x19b1   :  { %3993 = vmatprep.subr.bf16.mxu0 %v4395_v35 }
0x19b4   :  { %3995 = vmatpush3.bf16.msra.mxu0 %v3994_v3 }
0x19f0   :  { %v2747_v20 = vpop.permute.xlu1 %2746 }
0x19f1   :  { %3762 = vmatmul.mubr.msk.f32.vlgmr.msra.gmra.mrb[26].mxu1 %vm305_vm2, %v2747_v20 }
0x19f2   :  { %3783 = vmatprep.mubr.msk.f32.mxu1 %vm4396_vm3, %v4397_v52  ;;  %3986 = vmatpush3.bf16.msra.mxu1 %v3985_v19 }
0x19f3   :  { %3987 = vmatprep.subr.bf16.mxu1 %v4395_v35 }
0x19f6   :  { %3989 = vmatpush3.bf16.msra.mxu1 %v3988_v48 }
0x19f7   :  { %3996 = vmatprep.subr.bf16.mxu1 %v4395_v35 }
0x1a82   :  { %v2891_v21 = vpop.f32.mrb[28].mxu0 }
0x1a83   :  { %v2892_v23 = vadd.f32 %v4123_v22, %v2891_v21  ;;  %v3774_v24 = vpop.f32.mrb[29].mxu0 }
0x1a85   :  { %2903 = vrot.lane.b32.xlu0 %v2892_v23, %s4398_s7 }
0x1ac4   :  { %v2816_v27 = vpop.f32.mrb[26].mxu1 }
0x1ac5   :  { %v3763_v29 = vpop.f32.mrb[27].mxu1  ;;  %v2817_v32 = vadd.f32 %v4124_v31, %v2816_v27 }
0x1ac7   :  { %v2895_v33 = vadd.f32 %v2892_v23, %v2817_v32 }
0x1ac9   :  { %v3293_v34 = vmul.f32 -1.442695, %v2895_v33 }
0x1acb   :  { %4116 = vpow2.f32 %v3293_v34 }
0x1ad5   :  { %v4117_v36 = vpop.eup %4116 }
0x1ad6   :  { %v2899_v38 = vadd.f32 1.0, %v4117_v36 }
0x1ad8   :  { %4118 = vrcp.f32 %v2899_v38 }
0x1ae2   :  { %v4119_v39 = vpop.eup %4118 }
0x1ae3   :  { %v2913_v49 = vsub.f32 1.0, %v4119_v39  ;;  %v2919_v53 = vmul.f32 %v4119_v39, %v5070_v11  ;;  %v3119_v11 = vld [vmem:[%s5177_s18 + $0x10] sm:$0xff] }
0x1ae4   :  { %v4000_v13 = vpack.c.bf16 %v3120_v12, %v3119_v11 }
0x1af7   :  { %v2904_v40 = vpop.permute.xlu0 %2903 }
0x1af8   :  { %v2906_v43 = vmul.f32 %v4119_v39, %v2904_v40 }
0x1afa   :  { %2908 = vrot.lane.b32.xlu1 %v2906_v43, %s4398_s7 }
0x1b6c   :  { %v2909_v47 = vpop.permute.xlu1 %2908 }
0x1b6d   :  { %v2911_v26 = vadd.f32 %v2909_v47, %v2817_v32 }
0x1b6f   :  { %4120 = vtanh.f32 %v2911_v26 }
0x1b79   :  { %v4121_v28 = vpop.eup %4120 }
0x1b7a   :  { %2915 = vrot.lane.b32.xlu0 %v4121_v28, %s4399_s8 }
0x1b7e   :  { %2921 = vrot.lane.b32.xlu0 %v2743_v16, %s4399_s8 }
0x1bec   :  { %v2916_v25 = vpop.permute.xlu0 %2915 }
0x1bed   :  { %v2918_v37 = vmul.f32 %v2916_v25, %v2913_v49 }
0x1bef   :  { %v2920_v58 = vadd.f32 %v2919_v53, %v2918_v37 }
0x1bf0   :  { %v2922_v59 = vpop.permute.xlu0 %2921 }
0x1bf1   :  { %v2937_v60 = vrot.slane %v2920_v58, 2  ;;  %2925 = vst.msk [vmem:[#allocation19 - $0x6] sm:$0xc0] %vm2924_vm4, %v2922_v59 }
0x1bf3   :  { %v2943_v63 = vsel %vm213_vm0, %v2942_v30, %v2937_v60 }
0x1bf4   :  { %v2944_v42 = vmax.f32 %v2943_v63, 0.0 }
0x1bf6   :  { %2957 = vrot.lane.b32.xlu1 %v2944_v42, %s4399_s8 }
0x1bfa   :  { %2927 = vrot.lane.b32.xlu1 %v2920_v58, %s4399_s8 }
0x1c68   :  { %v2958_v0 = vpop.permute.xlu1 %2957 }
0x1c69   :  { %3784 = vmatmul.mubr.msk.f32.vlgmr.msra.gmra.mrb[28].mxu1 %vm305_vm2, %v2958_v0 }
0x1c6a   :  { %3805 = vmatprep.mubr.msk.f32.mxu1 %vm4396_vm3, %v4397_v52  ;;  %3998 = vmatpush3.bf16.msra.mxu1 %v3997_v6  ;;  %v3294_v52 = vld [vmem:[%s5174_s15] ss:$0 sm:$0xff]  ;;  %s4400_s15 = smov [#allocation19]  }
0x1c6b   :  { %3999 = vmatprep.subr.bf16.mxu1 %v4395_v35  ;;  %v3296_v35 = vld [vmem:[%s5176_s17] ss:$0 sm:$0xff]  ;;  %s3210_s24 = sshll.u32 %s4400_s15, 4  ;;  %s3211_s24 = int_to_ptr.vmem [resolvable:$true] %s3210_s24 }
0x1c6c   :  { %v2928_v1 = vpop.permute.xlu1 %2927  ;;  %s4345_s22 = scalar_lea.vmem %s3211_s24, 64  ;;  %p4350_p11 = scmp.lt.s32.totalorder %s3211_s24, %s3211_s24 }
0x1c6d   :  { %2932 = vst.msk [vmem:[#allocation19 + $0x2] sm:$0x3] %vm2931_vm7, %v2928_v1  ;;  %p4346_p10 = scmp.ne.s32.totalorder %s3211_s24, %s4345_s22  ;;  %p4351_p12 = scmp.lt.s32.totalorder %s4345_s22, %s4345_s22 }
0x1c6e   :  { %4001 = vmatpush3.bf16.msra.mxu1 %v4000_v13 }
0x1c6f   :  { %p4352_p13 = por %p4351_p12, %p4350_p11 }
0x1c71   :  { %p4353_p0 = pnand %p4352_p13, %p4346_p10 }
0x1d3c   :  { %v3027_v8 = vpop.f32.mrb[28].mxu1 }
0x1d3d   :  { %v3028_v9 = vadd.f32 %v3294_v52, %v3027_v8  ;;  %v3785_v10 = vpop.f32.mrb[29].mxu1 }
0x1d3f   :  { %v3031_v62 = vmax.f32 %v3028_v9, 0.0 }
0x1d41   :  { %3795 = vmatmul.mubr.msk.f32.vlgmr.msra.gmra.mrb[30].mxu0 %vm305_vm2, %v3031_v62 }
0x1e14   :  { %v3112_v14 = vpop.f32.mrb[30].mxu0 }
0x1e15   :  { %v3113_v15 = vadd.f32 %v3296_v35, %v3112_v14  ;;  %v3796_v4 = vpop.f32.mrb[31].mxu0 }
0x1e17   :  { %v3116_v16 = vmax.f32 %v3113_v15, 0.0 }
0x1e19   :  { %3806 = vmatmul.mubr.msk.f32.vlgmr.msra.gmra.mrb[30].mxu1 %vm305_vm2, %v3116_v16 }
0x1e1a   :  { %4356 = shalt.err (!%p4353_p0)
}
0x1e1b   :  { %s4357_s17 = scalar_lea.hbm %s5180_s21, 64 }
0x1e1c   :  { %p4358_p1 = scmp.ne.s32.totalorder %s5180_s21, %s4357_s17  ;;  %p4361_p2 = scmp.lt.u32.totalorder %s4357_s17, %s5180_s21 }
0x1e1e   :  { %p4363_p3 = pnand %p4361_p2, %p4358_p1 }
0x1e20   :  { %4366 = shalt.err (!%p4363_p3)
}
0x1e21   :  { %s5202_s9 = smov 2   ;;  %v3298_v17 = vld [vmem:[%s5178_s19] ss:$0 sm:$0xff]  ;;  %vm3201_vm8 = vcmask 15360  }
0x1e22   :  { %3216 = dma.vmem_to_hbm [thread:$0]  %s3211_s24, 64, %s5180_s21, [#allocation4], %s5201_s10, %s5201_s10, %s5202_s9  }
0x1eec   :  { %v3197_v18 = vpop.f32.mrb[30].mxu1 }
0x1eed   :  { %v3198_v20 = vadd.f32 %v3298_v17, %v3197_v18  ;;  %v3807_v21 = vpop.f32.mrb[31].mxu1 }
0x1eef   :  { %3202 = vst.msk [vmem:[%s5179_s20] sm:$0xff] %vm3201_vm8, %v3198_v20 }
0x1ef0   :  { %4379 = dma.done.wait [#allocation4], 64  }
0x1ef1   :  { %4380 = vsyncadd [#allocation4], 4294967232 }
0x1ef2   :  { %3222 = vsyncpa [#allocation3], 1 }
0x1ef3   :  { %3223 = vsyncpa [#allocation6], 1 }
0x1ef4   :  { %3224 = vsyncpa [#allocation9], 1 }
0x1ef5   :  { %3225 = vsyncpa [#allocation12], 1 }
0x1ef6   :  { %3226 = vsyncpa [#allocation15], 1 }
0x1ef7   :  { %3227 = vsyncpa [#allocation18], 1 }
0x1ef8   :  { %3228 = vsyncpa [#allocation4], 1 }

</bundles_post_ra>
